<compile_context>
chip_gen: v7x
topology: tpu7x:2x2x1
jax: 0.10.0
libtpu: 0.0.40
codegen_flags: <defaults>
</compile_context>

<pallas_src>
import functools
import math

import jax
import jax.numpy as jnp
from jax.experimental import pallas as pl
from jax.experimental.pallas import tpu as pltpu


def _round_up(v, m):
    return ((v + m - 1) // m) * m


def _conv_tap_kernel(x_ref, w_ref, b_ref, o_ref, acc_ref, *, k, ow, stride, tr):
    """One grid step: accumulate the K column-taps of kernel row `kh`.

    x_ref  : (1, TR, Wp, Cin)       row-shifted padded input block (tap row kh)
    w_ref  : (1, K, Cin, Cout_pad)  weight taps for kernel row kh
    b_ref  : (1, Cout_pad)          bias (f32)
    o_ref  : (TR*OW, Cout_pad)      lane-dense flat output tile
    acc_ref: (TR*OW, Cout_pad) f32  accumulator, resident across the kh axis
    """
    kh = pl.program_id(1)

    @pl.when(kh == 0)
    def _init():
        acc_ref[...] = jnp.zeros_like(acc_ref)

    for kw in range(k):
        if stride == 1:
            idx = pl.ds(kw, ow)
        else:
            idx = pl.ds(kw, ow, stride=stride)
        sl = x_ref[0, :, idx, :]                      # (TR, OW, Cin)
        lhs = sl.reshape(tr * ow, sl.shape[-1])       # (TR*OW, Cin)
        acc_ref[...] += jnp.dot(lhs, w_ref[0, kw],
                                preferred_element_type=jnp.float32)

    @pl.when(kh == k - 1)
    def _finalize():
        o_ref[...] = (acc_ref[...] + b_ref[...]).astype(o_ref.dtype)


@functools.partial(jax.jit,
                   static_argnames=("kernel_size", "stride", "compute_dtype"))
def reflection_conv(x, weight, bias, *, kernel_size, stride, compute_dtype=None):
    """x: (N, Cin, H, W); weight: (Cout, Cin, K, K); bias: (Cout,). Returns NCHW."""
    n, cin, h, w = x.shape
    cout = weight.shape[0]
    k = kernel_size
    s = stride
    pad = k // 2
    if compute_dtype is None:
        compute_dtype = x.dtype

    # Reflection padding (matches nn.ReflectionPad2d), then NHWC so the channel
    # (contraction) dim is lane-minor for the MXU.
    x_pad = jnp.pad(x, ((0, 0), (0, 0), (pad, pad), (pad, pad)), mode="reflect")
    x_pad = jnp.transpose(x_pad, (0, 2, 3, 1)).astype(compute_dtype)  # (N,Hp,Wp,Cin)
    hp, wp = h + 2 * pad, w + 2 * pad
    oh = (hp - k) // s + 1
    ow = (wp - k) // s + 1

    # kh tap-stack: one row-shifted (and row-strided) copy per kernel row.
    # (K x traffic instead of K^2 x full im2col; kw taps are fused in-kernel.)
    taps = [x_pad[:, kh:kh + s * (oh - 1) + 1:s, :, :] for kh in range(k)]
    x_taps = jnp.stack(taps, axis=0).reshape(k, n * oh, wp, cin)

    # Weight as (K, K, Cin, Cout_pad), Cout padded to a lane-dense multiple of 128.
    cout_pad = _round_up(cout, 128)
    w_t = jnp.transpose(weight, (2, 3, 1, 0))                 # (K, K, Cin, Cout)
    w_t = jnp.pad(w_t, ((0, 0), (0, 0), (0, 0), (0, cout_pad - cout)))
    w_t = w_t.astype(compute_dtype)
    b_row = jnp.pad(bias, (0, cout_pad - cout)).reshape(1, cout_pad)
    b_row = b_row.astype(jnp.float32)

    # ---------------- Tile selection (VMEM-budgeted, large M tiles) ----------
    rows = n * oh                              # number of (n, oh) output rows
    r_align = 8 // math.gcd(ow, 8)             # keep TR*OW a multiple of 8
    rows_aligned = _round_up(rows, r_align)

    comp_bytes = jnp.dtype(compute_dtype).itemsize
    out_bytes = jnp.dtype(x.dtype).itemsize
    target_pixels = 2048                       # ~2k output pixels per grid step
    tr = _round_up(max(1, target_pixels // ow), r_align)

    # Approximate VMEM footprint (tiled layouts round minor dims up to (8,128)).
    cin_lane = _round_up(cin, 128)
    vmem_budget = 20 * 1024 * 1024
    fixed = 2 * (k * _round_up(cin, 8) * cout_pad * comp_bytes
                 + 8 * cout_pad * 4)
    per_tr = (ow * cout_pad * (2 * out_bytes + 4)             # out (x2) + f32 acc
              + 2 * _round_up(wp, 8) * cin_lane * comp_bytes)  # input block (x2)
    tr_cap = max(r_align,
                 ((max(vmem_budget - fixed, per_tr) // per_tr)
                  // r_align) * r_align)
    tr = max(r_align, min(tr, tr_cap, rows_aligned))

    rows_pad = _round_up(rows, tr)
    if rows_pad != rows:
        x_taps = jnp.pad(x_taps, ((0, 0), (0, rows_pad - rows), (0, 0), (0, 0)))
    tm = tr * ow                               # flat output rows per tile

    kernel = functools.partial(_conv_tap_kernel, k=k, ow=ow, stride=s, tr=tr)
    out_flat = pl.pallas_call(
        kernel,
        out_shape=jax.ShapeDtypeStruct((rows_pad * ow, cout_pad), x.dtype),
        grid_spec=pltpu.PrefetchScalarGridSpec(
            num_scalar_prefetch=0,
            grid=(rows_pad // tr, k),          # reduction axis (kh) last
            in_specs=[
                pl.BlockSpec((1, tr, wp, cin), lambda i, kh: (kh, i, 0, 0)),
                pl.BlockSpec((1, k, cin, cout_pad), lambda i, kh: (kh, 0, 0, 0)),
                pl.BlockSpec((1, cout_pad), lambda i, kh: (0, 0)),
            ],
            out_specs=pl.BlockSpec((tm, cout_pad), lambda i, kh: (i, 0)),
            scratch_shapes=[pltpu.VMEM((tm, cout_pad), jnp.float32)],
        ),
        compiler_params=pltpu.CompilerParams(
            dimension_semantics=("parallel", "arbitrary"),
            vmem_limit_bytes=32 * 1024 * 1024,
        ),
    )(x_taps, w_t, b_row)

    out = out_flat[:rows * ow, :cout].reshape(n, oh, ow, cout)
    # TODO(synk): if the consumer accepts NHWC, return `out` directly and skip
    # this transpose (saves one HBM round trip of the output).
    return jnp.transpose(out, (0, 3, 1, 2))    # NCHW, matching PyTorch


def init_params(key, in_channels, out_channels, kernel_size):
    # Deterministic init mimicking PyTorch Conv2d defaults (uniform +/- 1/sqrt(fan_in)).
    fan_in = in_channels * kernel_size * kernel_size
    bound = 1.0 / jnp.sqrt(jnp.float32(fan_in))
    kw_, kb_ = jax.random.split(key)
    weight = jax.random.uniform(
        kw_, (out_channels, in_channels, kernel_size, kernel_size),
        dtype=jnp.float32, minval=-bound, maxval=bound)
    bias = jax.random.uniform(
        kb_, (out_channels,), dtype=jnp.float32, minval=-bound, maxval=bound)
    return weight, bias


if __name__ == "__main__":
    key = jax.random.PRNGKey(0)
    kx, kp = jax.random.split(key)

    N, Cin, H, W = 2, 4, 16, 16
    Cout, K, stride = 8, 3, 1

    x = jax.random.normal(kx, (N, Cin, H, W), dtype=jnp.float32)
    weight, bias = init_params(kp, Cin, Cout, K)

    out = reflection_conv(x, weight, bias, kernel_size=K, stride=stride)
    out = jax.block_until_ready(out)

    # Reference: XLA conv on the reflection-padded input.
    pad = K // 2
    x_pad = jnp.pad(x, ((0, 0), (0, 0), (pad, pad), (pad, pad)), mode="reflect")
    ref = jax.lax.conv_general_dilated(
        x_pad, weight, window_strides=(stride, stride), padding="VALID",
        dimension_numbers=("NCHW", "OIHW", "NCHW"),
    ) + bias.reshape(1, Cout, 1, 1)
    assert out.shape == ref.shape
    assert jnp.allclose(out, ref, atol=1e-3, rtol=1e-3)

    # bf16 compute path (f32 accumulation) -- the v5e/v6e MXU fast path.
    out_bf16 = reflection_conv(x, weight, bias, kernel_size=K, stride=stride,
                               compute_dtype=jnp.bfloat16)
    out_bf16 = jax.block_until_ready(out_bf16)
    assert out_bf16.shape == ref.shape
    assert jnp.allclose(out_bf16, ref, atol=1e-1, rtol=1e-1)

    print("KERNEL_OK")
</pallas_src>

<mosaic_0001>
module attributes {stable_mosaic.version = 11 : i64} {
  func.func @_conv_tap_kernel(%arg0: i32, %arg1: i32, %arg2: memref<1x32x18x4xf32, #tpu.memory_space<vmem>>, %arg3: memref<1x3x4x128xf32, #tpu.memory_space<vmem>>, %arg4: memref<1x128xf32, #tpu.memory_space<vmem>>, %arg5: memref<512x128xf32, #tpu.memory_space<vmem>>, %arg6: memref<512x128xf32, #tpu.memory_space<vmem>>) attributes {dimension_semantics = [#tpu.dimension_semantics<parallel>, #tpu.dimension_semantics<arbitrary>], iteration_bounds = array<i64: 1, 3>, scalar_prefetch = 0 : i64, scratch_operands = 1 : i64, tpu.core_type = #tpu.core_type<tc>, window_params = [{transform_indices = @transform_0, window_bounds = array<i64: 1, 32, 18, 4>}, {transform_indices = @transform_1, window_bounds = array<i64: 1, 3, 4, 128>}, {pipeline_mode = #tpu.pipeline_mode<synchronous>, transform_indices = @transform_2, window_bounds = array<i64: 1, 128>}, {transform_indices = @transform_3, window_bounds = array<i64: 512, 128>}]} {
    %c0_i32 = arith.constant 0 : i32
    %0 = arith.cmpi eq, %arg1, %c0_i32 : i32
    %1 = arith.extui %0 : i1 to i32
    %c0_i32_0 = arith.constant 0 : i32
    %2 = arith.cmpi ne, %1, %c0_i32_0 : i32
    scf.if %2 {
      %cst_37 = arith.constant 0.000000e+00 : f32
      %33 = vector.broadcast %cst_37 : f32 to vector<512x128xf32>
      %c0_38 = arith.constant 0 : index
      %c0_39 = arith.constant 0 : index
      %34 = vector.load %arg6[%c0_38, %c0_39] : memref<512x128xf32, #tpu.memory_space<vmem>>, vector<512x128xf32>
      tpu.vector_store %arg6[%c0_38, %c0_39], %33 {strides = array<i32>} : memref<512x128xf32, #tpu.memory_space<vmem>>, vector<512x128xf32>,
    } else {
    }
    %c0 = arith.constant 0 : index
    %c0_1 = arith.constant 0 : index
    %c0_2 = arith.constant 0 : index
    %c0_3 = arith.constant 0 : index
    %3 = vector.load %arg2[%c0, %c0_1, %c0_2, %c0_3] : memref<1x32x18x4xf32, #tpu.memory_space<vmem>>, vector<1x32x16x4xf32>
    %4 = vector.shape_cast %3 : vector<1x32x16x4xf32> to vector<32x16x4xf32>
    %5 = vector.shape_cast %4 : vector<32x16x4xf32> to vector<512x4xf32>
    %c0_4 = arith.constant 0 : index
    %c0_5 = arith.constant 0 : index
    %6 = vector.load %arg6[%c0_4, %c0_5] : memref<512x128xf32, #tpu.memory_space<vmem>>, vector<512x128xf32>
    %c0_6 = arith.constant 0 : index
    %c0_7 = arith.constant 0 : index
    %c0_8 = arith.constant 0 : index
    %c0_9 = arith.constant 0 : index
    %7 = vector.load %arg3[%c0_6, %c0_7, %c0_8, %c0_9] : memref<1x3x4x128xf32, #tpu.memory_space<vmem>>, vector<1x1x4x128xf32>
    %8 = vector.shape_cast %7 : vector<1x1x4x128xf32> to vector<4x128xf32>
    %cst = arith.constant dense<0.000000e+00> : vector<512x128xf32>
    %9 = tpu.matmul %5, %8, %cst {dimension_numbers = #tpu.dot_dimension_numbers<[1], [0], [0], [1], [0, 0, 1, 1], [], []>} : vector<512x4xf32>, vector<4x128xf32>, vector<512x128xf32> -> vector<512x128xf32>
    %10 = arith.addf %6, %9 : vector<512x128xf32>
    %c0_10 = arith.constant 0 : index
    %c0_11 = arith.constant 0 : index
    %11 = vector.load %arg6[%c0_10, %c0_11] : memref<512x128xf32, #tpu.memory_space<vmem>>, vector<512x128xf32>
    tpu.vector_store %arg6[%c0_10, %c0_11], %10 {strides = array<i32>} : memref<512x128xf32, #tpu.memory_space<vmem>>, vector<512x128xf32>,
    %c0_12 = arith.constant 0 : index
    %c0_13 = arith.constant 0 : index
    %c1 = arith.constant 1 : index
    %c0_14 = arith.constant 0 : index
    %12 = vector.load %arg2[%c0_12, %c0_13, %c1, %c0_14] : memref<1x32x18x4xf32, #tpu.memory_space<vmem>>, vector<1x32x16x4xf32>
    %13 = vector.shape_cast %12 : vector<1x32x16x4xf32> to vector<32x16x4xf32>
    %14 = vector.shape_cast %13 : vector<32x16x4xf32> to vector<512x4xf32>
    %c0_15 = arith.constant 0 : index
    %c0_16 = arith.constant 0 : index
    %15 = vector.load %arg6[%c0_15, %c0_16] : memref<512x128xf32, #tpu.memory_space<vmem>>, vector<512x128xf32>
    %c0_17 = arith.constant 0 : index
    %c1_18 = arith.constant 1 : index
    %c0_19 = arith.constant 0 : index
    %c0_20 = arith.constant 0 : index
    %16 = vector.load %arg3[%c0_17, %c1_18, %c0_19, %c0_20] : memref<1x3x4x128xf32, #tpu.memory_space<vmem>>, vector<1x1x4x128xf32>
    %17 = vector.shape_cast %16 : vector<1x1x4x128xf32> to vector<4x128xf32>
    %cst_21 = arith.constant dense<0.000000e+00> : vector<512x128xf32>
    %18 = tpu.matmul %14, %17, %cst_21 {dimension_numbers = #tpu.dot_dimension_numbers<[1], [0], [0], [1], [0, 0, 1, 1], [], []>} : vector<512x4xf32>, vector<4x128xf32>, vector<512x128xf32> -> vector<512x128xf32>
    %19 = arith.addf %15, %18 : vector<512x128xf32>
    %c0_22 = arith.constant 0 : index
    %c0_23 = arith.constant 0 : index
    %20 = vector.load %arg6[%c0_22, %c0_23] : memref<512x128xf32, #tpu.memory_space<vmem>>, vector<512x128xf32>
    tpu.vector_store %arg6[%c0_22, %c0_23], %19 {strides = array<i32>} : memref<512x128xf32, #tpu.memory_space<vmem>>, vector<512x128xf32>,
    %c0_24 = arith.constant 0 : index
    %c0_25 = arith.constant 0 : index
    %c2 = arith.constant 2 : index
    %c0_26 = arith.constant 0 : index
    %21 = vector.load %arg2[%c0_24, %c0_25, %c2, %c0_26] : memref<1x32x18x4xf32, #tpu.memory_space<vmem>>, vector<1x32x16x4xf32>
    %22 = vector.shape_cast %21 : vector<1x32x16x4xf32> to vector<32x16x4xf32>
    %23 = vector.shape_cast %22 : vector<32x16x4xf32> to vector<512x4xf32>
    %c0_27 = arith.constant 0 : index
    %c0_28 = arith.constant 0 : index
    %24 = vector.load %arg6[%c0_27, %c0_28] : memref<512x128xf32, #tpu.memory_space<vmem>>, vector<512x128xf32>
    %c0_29 = arith.constant 0 : index
    %c2_30 = arith.constant 2 : index
    %c0_31 = arith.constant 0 : index
    %c0_32 = arith.constant 0 : index
    %25 = vector.load %arg3[%c0_29, %c2_30, %c0_31, %c0_32] : memref<1x3x4x128xf32, #tpu.memory_space<vmem>>, vector<1x1x4x128xf32>
    %26 = vector.shape_cast %25 : vector<1x1x4x128xf32> to vector<4x128xf32>
    %cst_33 = arith.constant dense<0.000000e+00> : vector<512x128xf32>
    %27 = tpu.matmul %23, %26, %cst_33 {dimension_numbers = #tpu.dot_dimension_numbers<[1], [0], [0], [1], [0, 0, 1, 1], [], []>} : vector<512x4xf32>, vector<4x128xf32>, vector<512x128xf32> -> vector<512x128xf32>
    %28 = arith.addf %24, %27 : vector<512x128xf32>
    %c0_34 = arith.constant 0 : index
    %c0_35 = arith.constant 0 : index
    %29 = vector.load %arg6[%c0_34, %c0_35] : memref<512x128xf32, #tpu.memory_space<vmem>>, vector<512x128xf32>
    tpu.vector_store %arg6[%c0_34, %c0_35], %28 {strides = array<i32>} : memref<512x128xf32, #tpu.memory_space<vmem>>, vector<512x128xf32>,
    %c2_i32 = arith.constant 2 : i32
    %30 = arith.cmpi eq, %arg1, %c2_i32 : i32
    %31 = arith.extui %30 : i1 to i32
    %c0_i32_36 = arith.constant 0 : i32
    %32 = arith.cmpi ne, %31, %c0_i32_36 : i32
    scf.if %32 {
      %c0_37 = arith.constant 0 : index
      %c0_38 = arith.constant 0 : index
      %33 = vector.load %arg6[%c0_37, %c0_38] : memref<512x128xf32, #tpu.memory_space<vmem>>, vector<512x128xf32>
      %c0_39 = arith.constant 0 : index
      %c0_40 = arith.constant 0 : index
      %34 = vector.load %arg4[%c0_39, %c0_40] : memref<1x128xf32, #tpu.memory_space<vmem>>, vector<1x128xf32>
      %35 = vector.broadcast %34 : vector<1x128xf32> to vector<512x128xf32>
      %36 = arith.addf %33, %35 : vector<512x128xf32>
      %c0_41 = arith.constant 0 : index
      %c0_42 = arith.constant 0 : index
      %37 = vector.load %arg5[%c0_41, %c0_42] : memref<512x128xf32, #tpu.memory_space<vmem>>, vector<512x128xf32>
      tpu.vector_store %arg5[%c0_41, %c0_42], %36 {strides = array<i32>} : memref<512x128xf32, #tpu.memory_space<vmem>>, vector<512x128xf32>,
    } else {
    }
    return
  }
  func.func @transform_0(%arg0: i32, %arg1: i32) -> (i32, i32, i32, i32) {
    %c0_i32 = arith.constant 0 : i32
    %c0_i32_0 = arith.constant 0 : i32
    %c0_i32_1 = arith.constant 0 : i32
    return %arg1, %arg0, %c0_i32, %c0_i32_0 : i32, i32, i32, i32
  }
  func.func @transform_1(%arg0: i32, %arg1: i32) -> (i32, i32, i32, i32) {
    %c0_i32 = arith.constant 0 : i32
    %c0_i32_0 = arith.constant 0 : i32
    %c0_i32_1 = arith.constant 0 : i32
    %c0_i32_2 = arith.constant 0 : i32
    return %arg1, %c0_i32, %c0_i32_0, %c0_i32_1 : i32, i32, i32, i32
  }
  func.func @transform_2(%arg0: i32, %arg1: i32) -> (i32, i32) {
    %c0_i32 = arith.constant 0 : i32
    %c0_i32_0 = arith.constant 0 : i32
    %c0_i32_1 = arith.constant 0 : i32
    return %c0_i32, %c0_i32_0 : i32, i32
  }
  func.func @transform_3(%arg0: i32, %arg1: i32) -> (i32, i32) {
    %c0_i32 = arith.constant 0 : i32
    %c0_i32_0 = arith.constant 0 : i32
    return %arg0, %c0_i32 : i32, i32
  }
}

</mosaic_0001>

<bundles_post_ra>
// kernel: reflection_conv.1
= control target key start
LH: loop header
LB: loop body
LE: loop exit
PB: predicated region body
PF: predicated region fallthrough
CT: control target
= control target key end

     0   :  { %s4249_s12 = smov 0   ;;  %s4251_s13 = smov 0   ;;  %s5084_s0 = inlined_call_operand.vmem [shape: f32[3,32,18,4], index: 0, kind: input, shape index: {}]   ;;  %s5085_s1 = inlined_call_operand.vmem [shape: f32[3,3,4,128], index: 1, kind: input, shape index: {}]   ;;  %s5086_s2 = inlined_call_operand.vmem [shape: f32[1,128], index: 2, kind: input, shape index: {}]   ;;  %s5087_s3 = inlined_call_operand.vmem [shape: f32[512,128], index: 3, kind: output, shape index: {}]  }
   0x1   :  { %s4253_s14 = smov 0  }
   0x2 LB: > { %s22_s15 = sadd.s32 1, %s4222_s13  ;;  %p3095_p0 = scmp.ge.s32.totalorder %s4226_s14, 1  ;;  %s4226_s14 = sphi %s4253_s14, %s13_s14   ;;  %s4222_s13 = sphi %s4251_s13, %s5089_s13   ;;  %s4218_s12 = sphi %s4249_s12, %s5088_s12  }
   0x3   : > { %p23_p1 = scmp.ge.s32.totalorder %s22_s15, 3  ;;  %p167_p2 = scmp.lt.s32.totalorder %s4226_s14, 4 }
   0x5   : > { %s5091_s15 = smov (%p23_p1, %s22_s15), 0  ;;  %p168_p3 = pnand %p3095_p0, %p167_p2 }
   0x6   : > { %p202_p4 = scmp.lt.s32.totalorder (!%p168_p3), %s4218_s12, 2  ;;  %p3098_p5 = scmp.ne.s32.totalorder (!%p168_p3), %s4218_s12, 0 }
   0x7   : > { %171 = sbr.rel (%p168_p3) target bundleno = 474 (0x1da), region = 32 }
   0xe   : > { %s203_s16 = scalar_select %p202_p4, %s4218_s12, 2 }
   0xf   : > { %226 = sbr.rel (%p3098_p5) target bundleno = 48 (0x30), region = 36  ;;  %v4228_v0 = vmov (!%p3098_p5), 0.0  }
  0x10   : > { %s4177_s17 = smul.u32 768, %s203_s16  ;;  %227 = vst [vmem:[#allocation2] sm:$0xff] (!%p3098_p5), %v4228_v0  ;;  %228 = vst [vmem:[#allocation2 + $0x8] sm:$0xff] (!%p3098_p5), %v4228_v0 }
  0x11   : > { %s4178_s18 = smul.u32 12, %s203_s16  ;;  %229 = vst [vmem:[#allocation2 + $0x10] sm:$0xff] (!%p3098_p5), %v4228_v0  ;;  %230 = vst [vmem:[#allocation2 + $0x18] sm:$0xff] (!%p3098_p5), %v4228_v0 }
  0x12   : > { %s4274_s21 = scalar_lea.vmem %s5084_s0, %s4177_s17  ;;  %231 = vst [vmem:[#allocation2 + $0x20] sm:$0xff] (!%p3098_p5), %v4228_v0  ;;  %232 = vst [vmem:[#allocation2 + $0x28] sm:$0xff] (!%p3098_p5), %v4228_v0 }
  0x13   : > { %s4279_s24 = scalar_lea.vmem %s5085_s1, %s4178_s18  ;;  %233 = vst [vmem:[#allocation2 + $0x30] sm:$0xff] (!%p3098_p5), %v4228_v0  ;;  %234 = vst [vmem:[#allocation2 + $0x38] sm:$0xff] (!%p3098_p5), %v4228_v0 }
  0x14   : > { %235 = vst [vmem:[#allocation2 + $0x40] sm:$0xff] (!%p3098_p5), %v4228_v0  ;;  %236 = vst [vmem:[#allocation2 + $0x48] sm:$0xff] (!%p3098_p5), %v4228_v0 }
  0x15   : > { %237 = vst [vmem:[#allocation2 + $0x50] sm:$0xff] (!%p3098_p5), %v4228_v0  ;;  %238 = vst [vmem:[#allocation2 + $0x58] sm:$0xff] (!%p3098_p5), %v4228_v0 }
  0x16   : > { %239 = vst [vmem:[#allocation2 + $0x60] sm:$0xff] %v4228_v0  ;;  %240 = vst [vmem:[#allocation2 + $0x68] sm:$0xff] %v4228_v0 }
  0x17   : > { %241 = vst [vmem:[#allocation2 + $0x70] sm:$0xff] %v4228_v0  ;;  %242 = vst [vmem:[#allocation2 + $0x78] sm:$0xff] %v4228_v0 }
  0x18   : > { %243 = vst [vmem:[#allocation2 + $0x80] sm:$0xff] %v4228_v0  ;;  %244 = vst [vmem:[#allocation2 + $0x88] sm:$0xff] %v4228_v0 }
  0x19   : > { %245 = vst [vmem:[#allocation2 + $0x90] sm:$0xff] %v4228_v0  ;;  %246 = vst [vmem:[#allocation2 + $0x98] sm:$0xff] %v4228_v0 }
  0x1a   : > { %247 = vst [vmem:[#allocation2 + $0xa0] sm:$0xff] %v4228_v0  ;;  %248 = vst [vmem:[#allocation2 + $0xa8] sm:$0xff] %v4228_v0 }
  0x1b   : > { %249 = vst [vmem:[#allocation2 + $0xb0] sm:$0xff] %v4228_v0  ;;  %250 = vst [vmem:[#allocation2 + $0xb8] sm:$0xff] %v4228_v0 }
  0x1c   : > { %251 = vst [vmem:[#allocation2 + $0xc0] sm:$0xff] %v4228_v0  ;;  %252 = vst [vmem:[#allocation2 + $0xc8] sm:$0xff] %v4228_v0 }
  0x1d   : > { %253 = vst [vmem:[#allocation2 + $0xd0] sm:$0xff] %v4228_v0  ;;  %254 = vst [vmem:[#allocation2 + $0xd8] sm:$0xff] %v4228_v0 }
  0x1e   : > { %255 = vst [vmem:[#allocation2 + $0xe0] sm:$0xff] %v4228_v0  ;;  %256 = vst [vmem:[#allocation2 + $0xe8] sm:$0xff] %v4228_v0 }
  0x1f   : > { %257 = vst [vmem:[#allocation2 + $0xf0] sm:$0xff] %v4228_v0  ;;  %258 = vst [vmem:[#allocation2 + $0xf8] sm:$0xff] %v4228_v0 }
  0x20   : > { %259 = vst [vmem:[#allocation2 + $0x100] sm:$0xff] %v4228_v0  ;;  %260 = vst [vmem:[#allocation2 + $0x108] sm:$0xff] %v4228_v0 }
  0x21   : > { %261 = vst [vmem:[#allocation2 + $0x110] sm:$0xff] %v4228_v0  ;;  %262 = vst [vmem:[#allocation2 + $0x118] sm:$0xff] %v4228_v0 }
  0x22   : > { %263 = vst [vmem:[#allocation2 + $0x120] sm:$0xff] %v4228_v0  ;;  %264 = vst [vmem:[#allocation2 + $0x128] sm:$0xff] %v4228_v0 }
  0x23   : > { %265 = vst [vmem:[#allocation2 + $0x130] sm:$0xff] %v4228_v0  ;;  %266 = vst [vmem:[#allocation2 + $0x138] sm:$0xff] %v4228_v0 }
  0x24   : > { %267 = vst [vmem:[#allocation2 + $0x140] sm:$0xff] %v4228_v0  ;;  %268 = vst [vmem:[#allocation2 + $0x148] sm:$0xff] %v4228_v0 }
  0x25   : > { %269 = vst [vmem:[#allocation2 + $0x150] sm:$0xff] %v4228_v0  ;;  %270 = vst [vmem:[#allocation2 + $0x158] sm:$0xff] %v4228_v0 }
  0x26   : > { %271 = vst [vmem:[#allocation2 + $0x160] sm:$0xff] %v4228_v0  ;;  %272 = vst [vmem:[#allocation2 + $0x168] sm:$0xff] %v4228_v0 }
  0x27   : > { %273 = vst [vmem:[#allocation2 + $0x170] sm:$0xff] %v4228_v0  ;;  %274 = vst [vmem:[#allocation2 + $0x178] sm:$0xff] %v4228_v0 }
  0x28   : > { %275 = vst [vmem:[#allocation2 + $0x180] sm:$0xff] %v4228_v0  ;;  %276 = vst [vmem:[#allocation2 + $0x188] sm:$0xff] %v4228_v0 }
  0x29   : > { %277 = vst [vmem:[#allocation2 + $0x190] sm:$0xff] %v4228_v0  ;;  %278 = vst [vmem:[#allocation2 + $0x198] sm:$0xff] %v4228_v0 }
  0x2a   : > { %279 = vst [vmem:[#allocation2 + $0x1a0] sm:$0xff] %v4228_v0  ;;  %280 = vst [vmem:[#allocation2 + $0x1a8] sm:$0xff] %v4228_v0 }
  0x2b   : > { %281 = vst [vmem:[#allocation2 + $0x1b0] sm:$0xff] %v4228_v0  ;;  %282 = vst [vmem:[#allocation2 + $0x1b8] sm:$0xff] %v4228_v0 }
  0x2c   : > { %283 = vst [vmem:[#allocation2 + $0x1c0] sm:$0xff] %v4228_v0  ;;  %284 = vst [vmem:[#allocation2 + $0x1c8] sm:$0xff] %v4228_v0 }
  0x2d   : > { %285 = vst [vmem:[#allocation2 + $0x1d0] sm:$0xff] %v4228_v0  ;;  %286 = vst [vmem:[#allocation2 + $0x1d8] sm:$0xff] %v4228_v0 }
  0x2e   : > { %287 = vst [vmem:[#allocation2 + $0x1e0] sm:$0xff] %v4228_v0  ;;  %288 = vst [vmem:[#allocation2 + $0x1e8] sm:$0xff] %v4228_v0 }
  0x2f   : > { %289 = vst [vmem:[#allocation2 + $0x1f0] sm:$0xff] %v4228_v0  ;;  %290 = vst [vmem:[#allocation2 + $0x1f8] sm:$0xff] %v4228_v0 }
  0x30 PF: > { %v419_v1 = vld [vmem:[%s4279_s24] sm:$0xf]  ;;  %vm613_vm0 = vcmask 1043456   ;;  %v3164_v2 = vld [vmem:[%s4279_s24 + $0x4] sm:$0xf]  ;;  %vm420_vm1 = vcmask 31744  }
  0x31   : > { %v291_v3 = vld [vmem:[%s4274_s21] sm:$0xff]  ;;  %3497 = vmatprep.subr.msk.mxu1 %vm613_vm0, %v419_v1  ;;  %3595 = vmatprep.subr.msk.mxu0 %vm613_vm0, %v3164_v2  ;;  %v292_v5 = vld [vmem:[%s4274_s21 + $0x8] sm:$0xff]  ;;  %v293_v7 = vld [vmem:[%s4274_s21 + $0x18] sm:$0xff]  ;;  %p3296_p6 = scmp.ne.s32.totalorder %s4218_s12, 2 }
  0x32   : > { %v1130_v4 = vld [vmem:[%s4274_s21 + $0x1] sm:$0xff]  ;;  %3498 = vmatpush3.msk.msra.mxu1 %vm613_vm0, %v419_v1  ;;  %3499 = vmatprep.mubr.msk.f32.mxu1 %vm420_vm1, %v291_v3  ;;  %v1131_v6 = vld [vmem:[%s4274_s21 + $0x9] sm:$0xff]  ;;  %v1132_v8 = vld [vmem:[%s4274_s21 + $0x19] sm:$0xff] }
  0x33   : > { %3596 = vmatpush3.msk.msra.mxu0 %vm613_vm0, %v3164_v2  ;;  %3597 = vmatprep.mubr.msk.f32.mxu0 %vm420_vm1, %v1130_v4  ;;  %v3230_v9 = vld [vmem:[%s4279_s24 + $0x8] sm:$0xf]  ;;  %v294_v10 = vld [vmem:[%s4274_s21 + $0x20] sm:$0xff]  ;;  %v295_v12 = vld [vmem:[%s4274_s21 + $0x30] sm:$0xff] }
  0x34   : > { %3500 = vmatmul.mubr.msk.f32.vlgmr.msra.gmra.mrb[0].mxu1 %vm420_vm1, %v292_v5  ;;  %3791 = vmatprep.subr.msk.mxu1 %vm613_vm0, %v3164_v2  ;;  %v1133_v11 = vld [vmem:[%s4274_s21 + $0x21] sm:$0xff]  ;;  %v1134_v13 = vld [vmem:[%s4274_s21 + $0x31] sm:$0xff]  ;;  %v1135_v15 = vld [vmem:[%s4274_s21 + $0x39] sm:$0xff] }
  0x35   : > { %3598 = vmatmul.mubr.msk.f32.vlgmr.msra.gmra.mrb[0].mxu0 %vm420_vm1, %v1131_v6  ;;  %3792 = vmatpush3.msk.msra.mxu1 %vm613_vm0, %v3164_v2  ;;  %v296_v14 = vld [vmem:[%s4274_s21 + $0x38] sm:$0xff]  ;;  %v297_v16 = vld [vmem:[%s4274_s21 + $0x48] sm:$0xff]  ;;  %v298_v18 = vld [vmem:[%s4274_s21 + $0x50] sm:$0xff] }
  0x36   : > { %3502 = vmatprep.mubr.msk.f32.mxu1 %vm420_vm1, %v293_v7  ;;  %3600 = vmatprep.mubr.msk.f32.mxu0 %vm420_vm1, %v1132_v8  ;;  %v1136_v17 = vld [vmem:[%s4274_s21 + $0x49] sm:$0xff]  ;;  %v1137_v19 = vld [vmem:[%s4274_s21 + $0x51] sm:$0xff]  ;;  %v299_v20 = vld [vmem:[%s4274_s21 + $0x60] sm:$0xff] }
  0x37   : > { %3693 = vmatprep.subr.msk.mxu0 %vm613_vm0, %v3230_v9  ;;  %v1138_v21 = vld [vmem:[%s4274_s21 + $0x61] sm:$0xff]  ;;  %v1139_v23 = vld [vmem:[%s4274_s21 + $0x69] sm:$0xff]  ;;  %v301_v24 = vld [vmem:[%s4274_s21 + $0x78] sm:$0xff] }
  0x38   : > { %3503 = vmatmul.mubr.msk.f32.gmra.mrb[2].mxu1 %vm420_vm1, %v294_v10  ;;  %3694 = vmatpush3.msk.msra.mxu0 %vm613_vm0, %v3230_v9  ;;  %v300_v22 = vld [vmem:[%s4274_s21 + $0x68] sm:$0xff]  ;;  %v1140_v25 = vld [vmem:[%s4274_s21 + $0x79] sm:$0xff]  ;;  %v303_v28 = vld [vmem:[%s4274_s21 + $0x90] sm:$0xff] }
  0x39   : > { %3601 = vmatmul.mubr.msk.f32.gmra.mrb[2].mxu0 %vm420_vm1, %v1133_v11  ;;  %3505 = vmatprep.mubr.msk.f32.mxu1 %vm420_vm1, %v295_v12  ;;  %v302_v26 = vld [vmem:[%s4274_s21 + $0x80] sm:$0xff]  ;;  %v1142_v29 = vld [vmem:[%s4274_s21 + $0x91] sm:$0xff]  ;;  %v305_v32 = vld [vmem:[%s4274_s21 + $0xa8] sm:$0xff] }
  0x3a   : > { %3603 = vmatprep.mubr.msk.f32.mxu0 %vm420_vm1, %v1134_v13  ;;  %v1141_v27 = vld [vmem:[%s4274_s21 + $0x81] sm:$0xff]  ;;  %v304_v30 = vld [vmem:[%s4274_s21 + $0x98] sm:$0xff]  ;;  %v1144_v33 = vld [vmem:[%s4274_s21 + $0xa9] sm:$0xff] }
  0x3b   : > { %v1143_v31 = vld [vmem:[%s4274_s21 + $0x99] sm:$0xff]  ;;  %v306_v34 = vld [vmem:[%s4274_s21 + $0xb0] sm:$0xff]  ;;  %v1146_v37 = vld [vmem:[%s4274_s21 + $0xc1] sm:$0xff] }
  0x3c   : > { %3506 = vmatmul.mubr.msk.f32.gmra.mrb[4].mxu1 %vm420_vm1, %v296_v14  ;;  %v1145_v35 = vld [vmem:[%s4274_s21 + $0xb1] sm:$0xff]  ;;  %v307_v36 = vld [vmem:[%s4274_s21 + $0xc0] sm:$0xff]  ;;  %v308_v38 = vld [vmem:[%s4274_s21 + $0xc8] sm:$0xff] }
  0x3d   : > { %3604 = vmatmul.mubr.msk.f32.gmra.mrb[4].mxu0 %vm420_vm1, %v1135_v15  ;;  %3508 = vmatprep.mubr.msk.f32.mxu1 %vm420_vm1, %v297_v16  ;;  %v1147_v39 = vld [vmem:[%s4274_s21 + $0xc9] sm:$0xff]  ;;  %v309_v40 = vld [vmem:[%s4274_s21 + $0xd8] sm:$0xff]  ;;  %v310_v42 = vld [vmem:[%s4274_s21 + $0xe0] sm:$0xff] }
  0x3e   : > { %3606 = vmatprep.mubr.msk.f32.mxu0 %vm420_vm1, %v1136_v17  ;;  %v1148_v41 = vld [vmem:[%s4274_s21 + $0xd9] sm:$0xff]  ;;  %v1149_v43 = vld [vmem:[%s4274_s21 + $0xe1] sm:$0xff]  ;;  %v311_v44 = vld [vmem:[%s4274_s21 + $0xf0] sm:$0xff] }
  0x3f   : > { %v1150_v45 = vld [vmem:[%s4274_s21 + $0xf1] sm:$0xff]  ;;  %v1151_v47 = vld [vmem:[%s4274_s21 + $0xf9] sm:$0xff]  ;;  %v313_v48 = vld [vmem:[%s4274_s21 + $0x108] sm:$0xff] }
  0x40   : > { %3509 = vmatmul.mubr.msk.f32.gmra.mrb[6].mxu1 %vm420_vm1, %v298_v18  ;;  %v312_v46 = vld [vmem:[%s4274_s21 + $0xf8] sm:$0xff]  ;;  %v1152_v49 = vld [vmem:[%s4274_s21 + $0x109] sm:$0xff]  ;;  %v315_v52 = vld [vmem:[%s4274_s21 + $0x120] sm:$0xff] }
  0x41   : > { %3607 = vmatmul.mubr.msk.f32.gmra.mrb[6].mxu0 %vm420_vm1, %v1137_v19  ;;  %3511 = vmatprep.mubr.msk.f32.mxu1 %vm420_vm1, %v299_v20  ;;  %v314_v50 = vld [vmem:[%s4274_s21 + $0x110] sm:$0xff]  ;;  %v1154_v53 = vld [vmem:[%s4274_s21 + $0x121] sm:$0xff]  ;;  %v317_v56 = vld [vmem:[%s4274_s21 + $0x138] sm:$0xff] }
  0x42   : > { %3609 = vmatprep.mubr.msk.f32.mxu0 %vm420_vm1, %v1138_v21  ;;  %v1153_v51 = vld [vmem:[%s4274_s21 + $0x111] sm:$0xff]  ;;  %v316_v54 = vld [vmem:[%s4274_s21 + $0x128] sm:$0xff]  ;;  %v1156_v57 = vld [vmem:[%s4274_s21 + $0x139] sm:$0xff] }
  0x43   : > { %v1155_v55 = vld [vmem:[%s4274_s21 + $0x129] sm:$0xff]  ;;  %v318_v58 = vld [vmem:[%s4274_s21 + $0x140] sm:$0xff]  ;;  %v1158_v61 = vld [vmem:[%s4274_s21 + $0x151] sm:$0xff] }
  0x44   : > { %3512 = vmatmul.mubr.msk.f32.gmra.mrb[8].mxu1 %vm420_vm1, %v300_v22  ;;  %v1157_v59 = vld [vmem:[%s4274_s21 + $0x141] sm:$0xff]  ;;  %v319_v60 = vld [vmem:[%s4274_s21 + $0x150] sm:$0xff]  ;;  %v320_v62 = vld [vmem:[%s4274_s21 + $0x158] sm:$0xff] }
  0x45   : > { %3610 = vmatmul.mubr.msk.f32.gmra.mrb[8].mxu0 %vm420_vm1, %v1139_v23  ;;  %3514 = vmatprep.mubr.msk.f32.mxu1 %vm420_vm1, %v301_v24  ;;  %v1159_v63 = vld [vmem:[%s4274_s21 + $0x159] sm:$0xff]  ;;  %v321_v0 = vld [vmem:[%s4274_s21 + $0x168] sm:$0xff]  ;;  %v322_v2 = vld [vmem:[%s4274_s21 + $0x170] sm:$0xff] }
  0x46   : > { %3612 = vmatprep.mubr.msk.f32.mxu0 %vm420_vm1, %v1140_v25  ;;  %v1160_v1 = vld [vmem:[%s4274_s21 + $0x169] sm:$0xff]  ;;  %v1161_v3 = vld [vmem:[%s4274_s21 + $0x171] sm:$0xff]  ;;  %v323_v4 = vld [vmem:[%s4274_s21 + $0x180] sm:$0xff] }
  0x47   : > { %v1968_v5 = vld [vmem:[%s4274_s21 + $0x2] sm:$0xff]  ;;  %v1969_v7 = vld [vmem:[%s4274_s21 + $0xa] sm:$0xff]  ;;  %v325_v8 = vld [vmem:[%s4274_s21 + $0x198] sm:$0xff] }
  0x48   : > { %3515 = vmatmul.mubr.msk.f32.gmra.mrb[10].mxu1 %vm420_vm1, %v302_v26  ;;  %v324_v6 = vld [vmem:[%s4274_s21 + $0x188] sm:$0xff]  ;;  %v1970_v9 = vld [vmem:[%s4274_s21 + $0x1a] sm:$0xff]  ;;  %v327_v12 = vld [vmem:[%s4274_s21 + $0x1b0] sm:$0xff] }
  0x49   : > { %3613 = vmatmul.mubr.msk.f32.gmra.mrb[10].mxu0 %vm420_vm1, %v1141_v27  ;;  %3517 = vmatprep.mubr.msk.f32.mxu1 %vm420_vm1, %v303_v28  ;;  %v326_v10 = vld [vmem:[%s4274_s21 + $0x1a0] sm:$0xff]  ;;  %v1972_v13 = vld [vmem:[%s4274_s21 + $0x32] sm:$0xff]  ;;  %v329_v16 = vld [vmem:[%s4274_s21 + $0x1c8] sm:$0xff] }
  0x4a   : > { %3615 = vmatprep.mubr.msk.f32.mxu0 %vm420_vm1, %v1142_v29  ;;  %v1971_v11 = vld [vmem:[%s4274_s21 + $0x22] sm:$0xff]  ;;  %v328_v14 = vld [vmem:[%s4274_s21 + $0x1b8] sm:$0xff]  ;;  %v1974_v17 = vld [vmem:[%s4274_s21 + $0x4a] sm:$0xff] }
  0x4b   : > { %v1973_v15 = vld [vmem:[%s4274_s21 + $0x3a] sm:$0xff]  ;;  %v330_v18 = vld [vmem:[%s4274_s21 + $0x1d0] sm:$0xff]  ;;  %v1976_v21 = vld [vmem:[%s4274_s21 + $0x62] sm:$0xff] }
  0x4c   : > { %3518 = vmatmul.mubr.msk.f32.gmra.mrb[12].mxu1 %vm420_vm1, %v304_v30  ;;  %v1975_v19 = vld [vmem:[%s4274_s21 + $0x52] sm:$0xff]  ;;  %v331_v20 = vld [vmem:[%s4274_s21 + $0x1e0] sm:$0xff]  ;;  %v332_v22 = vld [vmem:[%s4274_s21 + $0x1e8] sm:$0xff] }
  0x4d   : > { %3616 = vmatmul.mubr.msk.f32.gmra.mrb[12].mxu0 %vm420_vm1, %v1143_v31  ;;  %3520 = vmatprep.mubr.msk.f32.mxu1 %vm420_vm1, %v305_v32  ;;  %v1977_v23 = vld [vmem:[%s4274_s21 + $0x6a] sm:$0xff]  ;;  %v333_v24 = vld [vmem:[%s4274_s21 + $0x1f8] sm:$0xff]  ;;  %v334_v26 = vld [vmem:[%s4274_s21 + $0x200] sm:$0xff] }
  0x4e   : > { %3618 = vmatprep.mubr.msk.f32.mxu0 %vm420_vm1, %v1144_v33  ;;  %v1978_v25 = vld [vmem:[%s4274_s21 + $0x7a] sm:$0xff]  ;;  %v1979_v27 = vld [vmem:[%s4274_s21 + $0x82] sm:$0xff]  ;;  %v335_v28 = vld [vmem:[%s4274_s21 + $0x210] sm:$0xff] }
  0x4f   : > { %v1980_v29 = vld [vmem:[%s4274_s21 + $0x92] sm:$0xff]  ;;  %v1981_v31 = vld [vmem:[%s4274_s21 + $0x9a] sm:$0xff]  ;;  %v337_v32 = vld [vmem:[%s4274_s21 + $0x228] sm:$0xff] }
  0x50   : > { %3521 = vmatmul.mubr.msk.f32.gmra.mrb[14].mxu1 %vm420_vm1, %v306_v34  ;;  %v336_v30 = vld [vmem:[%s4274_s21 + $0x218] sm:$0xff]  ;;  %v1982_v33 = vld [vmem:[%s4274_s21 + $0xaa] sm:$0xff] }
  0x51   : > { %3619 = vmatmul.mubr.msk.f32.gmra.mrb[14].mxu0 %vm420_vm1, %v1145_v35  ;;  %3523 = vmatprep.mubr.msk.f32.mxu1 %vm420_vm1, %v307_v36  ;;  %v338_v34 = vld [vmem:[%s4274_s21 + $0x230] sm:$0xff]  ;;  %v339_v36 = vld [vmem:[%s4274_s21 + $0x240] sm:$0xff] }
  0x52   : > { %3621 = vmatprep.mubr.msk.f32.mxu0 %vm420_vm1, %v1146_v37  ;;  %v1983_v35 = vld [vmem:[%s4274_s21 + $0xb2] sm:$0xff]  ;;  %v1984_v37 = vld [vmem:[%s4274_s21 + $0xc2] sm:$0xff] }
  0x54   : > { %3524 = vmatmul.mubr.msk.f32.gmra.mrb[16].mxu1 %vm420_vm1, %v308_v38  ;;  %v340_v38 = vld [vmem:[%s4274_s21 + $0x248] sm:$0xff] }
  0x55   : > { %3622 = vmatmul.mubr.msk.f32.gmra.mrb[16].mxu0 %vm420_vm1, %v1147_v39  ;;  %3526 = vmatprep.mubr.msk.f32.mxu1 %vm420_vm1, %v309_v40  ;;  %v1985_v39 = vld [vmem:[%s4274_s21 + $0xca] sm:$0xff]  ;;  %v341_v40 = vld [vmem:[%s4274_s21 + $0x258] sm:$0xff] }
  0x56   : > { %3624 = vmatprep.mubr.msk.f32.mxu0 %vm420_vm1, %v1148_v41  ;;  %v1986_v41 = vld [vmem:[%s4274_s21 + $0xda] sm:$0xff] }
  0x58   : > { %3527 = vmatmul.mubr.msk.f32.gmra.mrb[18].mxu1 %vm420_vm1, %v310_v42  ;;  %v342_v42 = vld [vmem:[%s4274_s21 + $0x260] sm:$0xff] }
  0x59   : > { %3625 = vmatmul.mubr.msk.f32.gmra.mrb[18].mxu0 %vm420_vm1, %v1149_v43  ;;  %3529 = vmatprep.mubr.msk.f32.mxu1 %vm420_vm1, %v311_v44  ;;  %v1987_v43 = vld [vmem:[%s4274_s21 + $0xe2] sm:$0xff]  ;;  %v343_v44 = vld [vmem:[%s4274_s21 + $0x270] sm:$0xff] }
  0x5a   : > { %3627 = vmatprep.mubr.msk.f32.mxu0 %vm420_vm1, %v1150_v45  ;;  %v1988_v45 = vld [vmem:[%s4274_s21 + $0xf2] sm:$0xff] }
  0x5c   : > { %3530 = vmatmul.mubr.msk.f32.gmra.mrb[20].mxu1 %vm420_vm1, %v312_v46  ;;  %v344_v46 = vld [vmem:[%s4274_s21 + $0x278] sm:$0xff] }
  0x5d   : > { %3628 = vmatmul.mubr.msk.f32.gmra.mrb[20].mxu0 %vm420_vm1, %v1151_v47  ;;  %3532 = vmatprep.mubr.msk.f32.mxu1 %vm420_vm1, %v313_v48  ;;  %v1989_v47 = vld [vmem:[%s4274_s21 + $0xfa] sm:$0xff]  ;;  %v345_v48 = vld [vmem:[%s4274_s21 + $0x288] sm:$0xff] }
  0x5e   : > { %3630 = vmatprep.mubr.msk.f32.mxu0 %vm420_vm1, %v1152_v49  ;;  %v1990_v49 = vld [vmem:[%s4274_s21 + $0x10a] sm:$0xff] }
  0x60   : > { %3533 = vmatmul.mubr.msk.f32.gmra.mrb[22].mxu1 %vm420_vm1, %v314_v50  ;;  %v346_v50 = vld [vmem:[%s4274_s21 + $0x290] sm:$0xff] }
  0x61   : > { %3631 = vmatmul.mubr.msk.f32.gmra.mrb[22].mxu0 %vm420_vm1, %v1153_v51  ;;  %3535 = vmatprep.mubr.msk.f32.mxu1 %vm420_vm1, %v315_v52  ;;  %v1991_v51 = vld [vmem:[%s4274_s21 + $0x112] sm:$0xff]  ;;  %v347_v52 = vld [vmem:[%s4274_s21 + $0x2a0] sm:$0xff] }
  0x62   : > { %3633 = vmatprep.mubr.msk.f32.mxu0 %vm420_vm1, %v1154_v53  ;;  %v1992_v53 = vld [vmem:[%s4274_s21 + $0x122] sm:$0xff] }
  0x64   : > { %3536 = vmatmul.mubr.msk.f32.gmra.mrb[24].mxu1 %vm420_vm1, %v316_v54  ;;  %v348_v54 = vld [vmem:[%s4274_s21 + $0x2a8] sm:$0xff] }
  0x65   : > { %3634 = vmatmul.mubr.msk.f32.gmra.mrb[24].mxu0 %vm420_vm1, %v1155_v55  ;;  %3538 = vmatprep.mubr.msk.f32.mxu1 %vm420_vm1, %v317_v56  ;;  %v1993_v55 = vld [vmem:[%s4274_s21 + $0x12a] sm:$0xff]  ;;  %v349_v56 = vld [vmem:[%s4274_s21 + $0x2b8] sm:$0xff] }
  0x66   : > { %3636 = vmatprep.mubr.msk.f32.mxu0 %vm420_vm1, %v1156_v57  ;;  %v1994_v57 = vld [vmem:[%s4274_s21 + $0x13a] sm:$0xff] }
  0x68   : > { %3539 = vmatmul.mubr.msk.f32.gmra.mrb[26].mxu1 %vm420_vm1, %v318_v58  ;;  %v350_v58 = vld [vmem:[%s4274_s21 + $0x2c0] sm:$0xff] }
  0x69   : > { %3637 = vmatmul.mubr.msk.f32.gmra.mrb[26].mxu0 %vm420_vm1, %v1157_v59  ;;  %3541 = vmatprep.mubr.msk.f32.mxu1 %vm420_vm1, %v319_v60  ;;  %v1995_v59 = vld [vmem:[%s4274_s21 + $0x142] sm:$0xff]  ;;  %v351_v60 = vld [vmem:[%s4274_s21 + $0x2d0] sm:$0xff] }
  0x6a   : > { %3639 = vmatprep.mubr.msk.f32.mxu0 %vm420_vm1, %v1158_v61  ;;  %v1996_v61 = vld [vmem:[%s4274_s21 + $0x152] sm:$0xff] }
  0x6c   : > { %3542 = vmatmul.mubr.msk.f32.gmra.mrb[28].mxu1 %vm420_vm1, %v320_v62  ;;  %v352_v62 = vld [vmem:[%s4274_s21 + $0x2d8] sm:$0xff] }
  0x6d   : > { %3640 = vmatmul.mubr.msk.f32.gmra.mrb[28].mxu0 %vm420_vm1, %v1159_v63  ;;  %3544 = vmatprep.mubr.msk.f32.mxu1 %vm420_vm1, %v321_v0  ;;  %v1997_v63 = vld [vmem:[%s4274_s21 + $0x15a] sm:$0xff]  ;;  %v353_v0 = vld [vmem:[%s4274_s21 + $0x2e8] sm:$0xff] }
  0x6e   : > { %3642 = vmatprep.mubr.msk.f32.mxu0 %vm420_vm1, %v1160_v1  ;;  %v1998_v1 = vld [vmem:[%s4274_s21 + $0x16a] sm:$0xff] }
  0x70   : > { %3545 = vmatmul.mubr.msk.f32.gmra.mrb[30].mxu1 %vm420_vm1, %v322_v2  ;;  %v354_v2 = vld [vmem:[%s4274_s21 + $0x2f0] sm:$0xff] }
  0x71   : > { %3643 = vmatmul.mubr.msk.f32.gmra.mrb[30].mxu0 %vm420_vm1, %v1161_v3  ;;  %3547 = vmatprep.mubr.msk.f32.mxu1 %vm420_vm1, %v323_v4  ;;  %v1999_v3 = vld [vmem:[%s4274_s21 + $0x172] sm:$0xff]  ;;  %v1162_v4 = vld [vmem:[%s4274_s21 + $0x181] sm:$0xff] }
  0x72   : > { %3695 = vmatprep.mubr.msk.f32.mxu0 %vm420_vm1, %v1968_v5  ;;  %v2000_v5 = vld [vmem:[%s4274_s21 + $0x182] sm:$0xff] }
  0x74   : > { %3548 = vmatmul.mubr.msk.f32.gmra.mrb[32].mxu1 %vm420_vm1, %v324_v6  ;;  %v1163_v6 = vld [vmem:[%s4274_s21 + $0x189] sm:$0xff] }
  0x75   : > { %3696 = vmatmul.mubr.msk.f32.vlgmr.msra.gmra.mrb[0].mxu0 %vm420_vm1, %v1969_v7  ;;  %3550 = vmatprep.mubr.msk.f32.mxu1 %vm420_vm1, %v325_v8  ;;  %v1164_v7 = vld [vmem:[%s4274_s21 + $0x199] sm:$0xff]  ;;  %v2001_v8 = vld [vmem:[%s4274_s21 + $0x18a] sm:$0xff] }
  0x76   : > { %3698 = vmatprep.mubr.msk.f32.mxu0 %vm420_vm1, %v1970_v9  ;;  %v2002_v9 = vld [vmem:[%s4274_s21 + $0x19a] sm:$0xff] }
  0x78   : > { %3551 = vmatmul.mubr.msk.f32.gmra.mrb[34].mxu1 %vm420_vm1, %v326_v10  ;;  %v1165_v10 = vld [vmem:[%s4274_s21 + $0x1a1] sm:$0xff] }
  0x79   : > { %3699 = vmatmul.mubr.msk.f32.gmra.mrb[2].mxu0 %vm420_vm1, %v1971_v11  ;;  %3553 = vmatprep.mubr.msk.f32.mxu1 %vm420_vm1, %v327_v12  ;;  %v1166_v11 = vld [vmem:[%s4274_s21 + $0x1b1] sm:$0xff]  ;;  %v2003_v12 = vld [vmem:[%s4274_s21 + $0x1a2] sm:$0xff] }
  0x7a   : > { %3701 = vmatprep.mubr.msk.f32.mxu0 %vm420_vm1, %v1972_v13  ;;  %v2004_v13 = vld [vmem:[%s4274_s21 + $0x1b2] sm:$0xff] }
  0x7c   : > { %3554 = vmatmul.mubr.msk.f32.gmra.mrb[36].mxu1 %vm420_vm1, %v328_v14  ;;  %v1167_v14 = vld [vmem:[%s4274_s21 + $0x1b9] sm:$0xff] }
  0x7d   : > { %3702 = vmatmul.mubr.msk.f32.gmra.mrb[4].mxu0 %vm420_vm1, %v1973_v15  ;;  %3556 = vmatprep.mubr.msk.f32.mxu1 %vm420_vm1, %v329_v16  ;;  %v1168_v15 = vld [vmem:[%s4274_s21 + $0x1c9] sm:$0xff]  ;;  %v2005_v16 = vld [vmem:[%s4274_s21 + $0x1ba] sm:$0xff] }
  0x7e   : > { %3704 = vmatprep.mubr.msk.f32.mxu0 %vm420_vm1, %v1974_v17  ;;  %v2006_v17 = vld [vmem:[%s4274_s21 + $0x1ca] sm:$0xff] }
  0x80   : > { %3557 = vmatmul.mubr.msk.f32.gmra.mrb[38].mxu1 %vm420_vm1, %v330_v18  ;;  %v1169_v18 = vld [vmem:[%s4274_s21 + $0x1d1] sm:$0xff] }
  0x81   : > { %3705 = vmatmul.mubr.msk.f32.gmra.mrb[6].mxu0 %vm420_vm1, %v1975_v19  ;;  %3559 = vmatprep.mubr.msk.f32.mxu1 %vm420_vm1, %v331_v20  ;;  %v1170_v19 = vld [vmem:[%s4274_s21 + $0x1e1] sm:$0xff]  ;;  %v2007_v20 = vld [vmem:[%s4274_s21 + $0x1d2] sm:$0xff] }
  0x82   : > { %3707 = vmatprep.mubr.msk.f32.mxu0 %vm420_vm1, %v1976_v21  ;;  %v2008_v21 = vld [vmem:[%s4274_s21 + $0x1e2] sm:$0xff] }
  0x84   : > { %3560 = vmatmul.mubr.msk.f32.gmra.mrb[40].mxu1 %vm420_vm1, %v332_v22  ;;  %v1171_v22 = vld [vmem:[%s4274_s21 + $0x1e9] sm:$0xff] }
  0x85   : > { %3708 = vmatmul.mubr.msk.f32.gmra.mrb[8].mxu0 %vm420_vm1, %v1977_v23  ;;  %3562 = vmatprep.mubr.msk.f32.mxu1 %vm420_vm1, %v333_v24  ;;  %v1172_v23 = vld [vmem:[%s4274_s21 + $0x1f9] sm:$0xff]  ;;  %v2009_v24 = vld [vmem:[%s4274_s21 + $0x1ea] sm:$0xff] }
  0x86   : > { %3710 = vmatprep.mubr.msk.f32.mxu0 %vm420_vm1, %v1978_v25  ;;  %v2010_v25 = vld [vmem:[%s4274_s21 + $0x1fa] sm:$0xff] }
  0x88   : > { %3563 = vmatmul.mubr.msk.f32.gmra.mrb[42].mxu1 %vm420_vm1, %v334_v26  ;;  %v1173_v26 = vld [vmem:[%s4274_s21 + $0x201] sm:$0xff] }
  0x89   : > { %3711 = vmatmul.mubr.msk.f32.gmra.mrb[10].mxu0 %vm420_vm1, %v1979_v27  ;;  %3565 = vmatprep.mubr.msk.f32.mxu1 %vm420_vm1, %v335_v28  ;;  %v1174_v27 = vld [vmem:[%s4274_s21 + $0x211] sm:$0xff]  ;;  %v2011_v28 = vld [vmem:[%s4274_s21 + $0x202] sm:$0xff] }
  0x8a   : > { %3713 = vmatprep.mubr.msk.f32.mxu0 %vm420_vm1, %v1980_v29  ;;  %v2012_v29 = vld [vmem:[%s4274_s21 + $0x212] sm:$0xff] }
  0x8c   : > { %3566 = vmatmul.mubr.msk.f32.gmra.mrb[44].mxu1 %vm420_vm1, %v336_v30  ;;  %v1175_v30 = vld [vmem:[%s4274_s21 + $0x219] sm:$0xff] }
  0x8d   : > { %3714 = vmatmul.mubr.msk.f32.gmra.mrb[12].mxu0 %vm420_vm1, %v1981_v31  ;;  %3568 = vmatprep.mubr.msk.f32.mxu1 %vm420_vm1, %v337_v32  ;;  %v1176_v31 = vld [vmem:[%s4274_s21 + $0x229] sm:$0xff]  ;;  %v2013_v32 = vld [vmem:[%s4274_s21 + $0x21a] sm:$0xff] }
  0x8e   : > { %3716 = vmatprep.mubr.msk.f32.mxu0 %vm420_vm1, %v1982_v33  ;;  %v2014_v33 = vld [vmem:[%s4274_s21 + $0x22a] sm:$0xff] }
  0x90   : > { %3569 = vmatmul.mubr.msk.f32.gmra.mrb[46].mxu1 %vm420_vm1, %v338_v34  ;;  %v1177_v34 = vld [vmem:[%s4274_s21 + $0x231] sm:$0xff] }
  0x91   : > { %3717 = vmatmul.mubr.msk.f32.gmra.mrb[14].mxu0 %vm420_vm1, %v1983_v35  ;;  %3571 = vmatprep.mubr.msk.f32.mxu1 %vm420_vm1, %v339_v36  ;;  %v1178_v35 = vld [vmem:[%s4274_s21 + $0x241] sm:$0xff]  ;;  %v2015_v36 = vld [vmem:[%s4274_s21 + $0x232] sm:$0xff] }
  0x92   : > { %3719 = vmatprep.mubr.msk.f32.mxu0 %vm420_vm1, %v1984_v37  ;;  %v2016_v37 = vld [vmem:[%s4274_s21 + $0x242] sm:$0xff] }
  0x94   : > { %3572 = vmatmul.mubr.msk.f32.gmra.mrb[48].mxu1 %vm420_vm1, %v340_v38  ;;  %v1179_v38 = vld [vmem:[%s4274_s21 + $0x249] sm:$0xff] }
  0x95   : > { %3720 = vmatmul.mubr.msk.f32.gmra.mrb[16].mxu0 %vm420_vm1, %v1985_v39  ;;  %3574 = vmatprep.mubr.msk.f32.mxu1 %vm420_vm1, %v341_v40  ;;  %v1180_v39 = vld [vmem:[%s4274_s21 + $0x259] sm:$0xff]  ;;  %v2017_v40 = vld [vmem:[%s4274_s21 + $0x24a] sm:$0xff] }
  0x96   : > { %3722 = vmatprep.mubr.msk.f32.mxu0 %vm420_vm1, %v1986_v41  ;;  %v2018_v41 = vld [vmem:[%s4274_s21 + $0x25a] sm:$0xff] }
  0x98   : > { %3575 = vmatmul.mubr.msk.f32.gmra.mrb[50].mxu1 %vm420_vm1, %v342_v42  ;;  %v1181_v42 = vld [vmem:[%s4274_s21 + $0x261] sm:$0xff] }
  0x99   : > { %3723 = vmatmul.mubr.msk.f32.gmra.mrb[18].mxu0 %vm420_vm1, %v1987_v43  ;;  %3577 = vmatprep.mubr.msk.f32.mxu1 %vm420_vm1, %v343_v44  ;;  %v1182_v43 = vld [vmem:[%s4274_s21 + $0x271] sm:$0xff]  ;;  %v2019_v44 = vld [vmem:[%s4274_s21 + $0x262] sm:$0xff] }
  0x9a   : > { %3725 = vmatprep.mubr.msk.f32.mxu0 %vm420_vm1, %v1988_v45  ;;  %v2020_v45 = vld [vmem:[%s4274_s21 + $0x272] sm:$0xff] }
  0x9c   : > { %3578 = vmatmul.mubr.msk.f32.gmra.mrb[52].mxu1 %vm420_vm1, %v344_v46  ;;  %v1183_v46 = vld [vmem:[%s4274_s21 + $0x279] sm:$0xff] }
  0x9d   : > { %3726 = vmatmul.mubr.msk.f32.gmra.mrb[20].mxu0 %vm420_vm1, %v1989_v47  ;;  %3580 = vmatprep.mubr.msk.f32.mxu1 %vm420_vm1, %v345_v48  ;;  %v1184_v47 = vld [vmem:[%s4274_s21 + $0x289] sm:$0xff]  ;;  %v2021_v48 = vld [vmem:[%s4274_s21 + $0x27a] sm:$0xff] }
  0x9e   : > { %3728 = vmatprep.mubr.msk.f32.mxu0 %vm420_vm1, %v1990_v49  ;;  %v2022_v49 = vld [vmem:[%s4274_s21 + $0x28a] sm:$0xff] }
  0xa0   : > { %3581 = vmatmul.mubr.msk.f32.gmra.mrb[54].mxu1 %vm420_vm1, %v346_v50  ;;  %v1185_v50 = vld [vmem:[%s4274_s21 + $0x291] sm:$0xff] }
  0xa1   : > { %3729 = vmatmul.mubr.msk.f32.gmra.mrb[22].mxu0 %vm420_vm1, %v1991_v51  ;;  %3583 = vmatprep.mubr.msk.f32.mxu1 %vm420_vm1, %v347_v52  ;;  %v1186_v51 = vld [vmem:[%s4274_s21 + $0x2a1] sm:$0xff]  ;;  %v2023_v52 = vld [vmem:[%s4274_s21 + $0x292] sm:$0xff] }
  0xa2   : > { %3731 = vmatprep.mubr.msk.f32.mxu0 %vm420_vm1, %v1992_v53  ;;  %v2024_v53 = vld [vmem:[%s4274_s21 + $0x2a2] sm:$0xff] }
  0xa4   : > { %3584 = vmatmul.mubr.msk.f32.gmra.mrb[56].mxu1 %vm420_vm1, %v348_v54  ;;  %v1187_v54 = vld [vmem:[%s4274_s21 + $0x2a9] sm:$0xff] }
  0xa5   : > { %3732 = vmatmul.mubr.msk.f32.gmra.mrb[24].mxu0 %vm420_vm1, %v1993_v55  ;;  %3586 = vmatprep.mubr.msk.f32.mxu1 %vm420_vm1, %v349_v56  ;;  %v1188_v55 = vld [vmem:[%s4274_s21 + $0x2b9] sm:$0xff]  ;;  %v2025_v56 = vld [vmem:[%s4274_s21 + $0x2aa] sm:$0xff] }
  0xa6   : > { %3734 = vmatprep.mubr.msk.f32.mxu0 %vm420_vm1, %v1994_v57  ;;  %v2026_v57 = vld [vmem:[%s4274_s21 + $0x2ba] sm:$0xff] }
  0xa8   : > { %3587 = vmatmul.mubr.msk.f32.gmra.mrb[58].mxu1 %vm420_vm1, %v350_v58  ;;  %v1189_v58 = vld [vmem:[%s4274_s21 + $0x2c1] sm:$0xff] }
  0xa9   : > { %3735 = vmatmul.mubr.msk.f32.gmra.mrb[26].mxu0 %vm420_vm1, %v1995_v59  ;;  %3589 = vmatprep.mubr.msk.f32.mxu1 %vm420_vm1, %v351_v60  ;;  %v1190_v59 = vld [vmem:[%s4274_s21 + $0x2d1] sm:$0xff]  ;;  %v2027_v60 = vld [vmem:[%s4274_s21 + $0x2c2] sm:$0xff] }
  0xaa   : > { %3737 = vmatprep.mubr.msk.f32.mxu0 %vm420_vm1, %v1996_v61  ;;  %v2028_v61 = vld [vmem:[%s4274_s21 + $0x2d2] sm:$0xff] }
  0xac   : > { %3590 = vmatmul.mubr.msk.f32.gmra.mrb[60].mxu1 %vm420_vm1, %v352_v62  ;;  %v1191_v62 = vld [vmem:[%s4274_s21 + $0x2d9] sm:$0xff] }
  0xad   : > { %3738 = vmatmul.mubr.msk.f32.gmra.mrb[28].mxu0 %vm420_vm1, %v1997_v63  ;;  %3592 = vmatprep.mubr.msk.f32.mxu1 %vm420_vm1, %v353_v0  ;;  %v1192_v63 = vld [vmem:[%s4274_s21 + $0x2e9] sm:$0xff]  ;;  %v2029_v0 = vld [vmem:[%s4274_s21 + $0x2da] sm:$0xff] }
  0xae   : > { %3740 = vmatprep.mubr.msk.f32.mxu0 %vm420_vm1, %v1998_v1  ;;  %v2030_v1 = vld [vmem:[%s4274_s21 + $0x2ea] sm:$0xff] }
  0xb0   : > { %3593 = vmatmul.mubr.msk.f32.gmra.mrb[62].mxu1 %vm420_vm1, %v354_v2  ;;  %v1193_v2 = vld [vmem:[%s4274_s21 + $0x2f1] sm:$0xff] }
  0xb1   : > { %3741 = vmatmul.mubr.msk.f32.gmra.mrb[30].mxu0 %vm420_vm1, %v1999_v3  ;;  %3645 = vmatprep.mubr.msk.f32.mxu1 %vm420_vm1, %v1162_v4  ;;  %v2031_v3 = vld [vmem:[%s4274_s21 + $0x2f2] sm:$0xff] }
  0xb2   : > { %3743 = vmatprep.mubr.msk.f32.mxu0 %vm420_vm1, %v2000_v5 }
  0xb4   : > { %3646 = vmatmul.mubr.msk.f32.vlgmr.msra.gmra.mrb[32].mxu1 %vm420_vm1, %v1163_v6 }
  0xb5   : > { %3648 = vmatprep.mubr.msk.f32.mxu1 %vm420_vm1, %v1164_v7  ;;  %3744 = vmatmul.mubr.msk.f32.gmra.mrb[32].mxu0 %vm420_vm1, %v2001_v8 }
  0xb6   : > { %3746 = vmatprep.mubr.msk.f32.mxu0 %vm420_vm1, %v2002_v9 }
  0xb8   : > { %3649 = vmatmul.mubr.msk.f32.gmra.mrb[34].mxu1 %vm420_vm1, %v1165_v10 }
  0xb9   : > { %3651 = vmatprep.mubr.msk.f32.mxu1 %vm420_vm1, %v1166_v11  ;;  %3747 = vmatmul.mubr.msk.f32.gmra.mrb[34].mxu0 %vm420_vm1, %v2003_v12 }
  0xba   : > { %3749 = vmatprep.mubr.msk.f32.mxu0 %vm420_vm1, %v2004_v13 }
  0xbc   : > { %3652 = vmatmul.mubr.msk.f32.gmra.mrb[36].mxu1 %vm420_vm1, %v1167_v14 }
  0xbd   : > { %3654 = vmatprep.mubr.msk.f32.mxu1 %vm420_vm1, %v1168_v15  ;;  %3750 = vmatmul.mubr.msk.f32.gmra.mrb[36].mxu0 %vm420_vm1, %v2005_v16 }
  0xbe   : > { %3752 = vmatprep.mubr.msk.f32.mxu0 %vm420_vm1, %v2006_v17 }
  0xc0   : > { %3655 = vmatmul.mubr.msk.f32.gmra.mrb[38].mxu1 %vm420_vm1, %v1169_v18 }
  0xc1   : > { %3657 = vmatprep.mubr.msk.f32.mxu1 %vm420_vm1, %v1170_v19  ;;  %3753 = vmatmul.mubr.msk.f32.gmra.mrb[38].mxu0 %vm420_vm1, %v2007_v20 }
  0xc2   : > { %3755 = vmatprep.mubr.msk.f32.mxu0 %vm420_vm1, %v2008_v21 }
  0xc4   : > { %3658 = vmatmul.mubr.msk.f32.gmra.mrb[40].mxu1 %vm420_vm1, %v1171_v22 }
  0xc5   : > { %3660 = vmatprep.mubr.msk.f32.mxu1 %vm420_vm1, %v1172_v23  ;;  %3756 = vmatmul.mubr.msk.f32.gmra.mrb[40].mxu0 %vm420_vm1, %v2009_v24 }
  0xc6   : > { %3758 = vmatprep.mubr.msk.f32.mxu0 %vm420_vm1, %v2010_v25 }
  0xc8   : > { %3661 = vmatmul.mubr.msk.f32.gmra.mrb[42].mxu1 %vm420_vm1, %v1173_v26 }
  0xc9   : > { %3663 = vmatprep.mubr.msk.f32.mxu1 %vm420_vm1, %v1174_v27  ;;  %3759 = vmatmul.mubr.msk.f32.gmra.mrb[42].mxu0 %vm420_vm1, %v2011_v28 }
  0xca   : > { %3761 = vmatprep.mubr.msk.f32.mxu0 %vm420_vm1, %v2012_v29 }
  0xcc   : > { %3664 = vmatmul.mubr.msk.f32.gmra.mrb[44].mxu1 %vm420_vm1, %v1175_v30 }
  0xcd   : > { %3666 = vmatprep.mubr.msk.f32.mxu1 %vm420_vm1, %v1176_v31  ;;  %3762 = vmatmul.mubr.msk.f32.gmra.mrb[44].mxu0 %vm420_vm1, %v2013_v32 }
  0xce   : > { %3764 = vmatprep.mubr.msk.f32.mxu0 %vm420_vm1, %v2014_v33 }
  0xd0   : > { %3667 = vmatmul.mubr.msk.f32.gmra.mrb[46].mxu1 %vm420_vm1, %v1177_v34 }
  0xd1   : > { %3669 = vmatprep.mubr.msk.f32.mxu1 %vm420_vm1, %v1178_v35  ;;  %3765 = vmatmul.mubr.msk.f32.gmra.mrb[46].mxu0 %vm420_vm1, %v2015_v36  ;;  %v356_v35 = vld [vmem:[#allocation2 + $0x8] sm:$0xff] }
  0xd2   : > { %3767 = vmatprep.mubr.msk.f32.mxu0 %vm420_vm1, %v2016_v37  ;;  %v355_v37 = vld [vmem:[#allocation2] sm:$0xff] }
  0xd4   : > { %3670 = vmatmul.mubr.msk.f32.gmra.mrb[48].mxu1 %vm420_vm1, %v1179_v38 }
  0xd5   : > { %3672 = vmatprep.mubr.msk.f32.mxu1 %vm420_vm1, %v1180_v39  ;;  %3768 = vmatmul.mubr.msk.f32.gmra.mrb[48].mxu0 %vm420_vm1, %v2017_v40  ;;  %v358_v40 = vld [vmem:[#allocation2 + $0x18] sm:$0xff] }
  0xd6   : > { %3770 = vmatprep.mubr.msk.f32.mxu0 %vm420_vm1, %v2018_v41 }
  0xd8   : > { %3673 = vmatmul.mubr.msk.f32.gmra.mrb[50].mxu1 %vm420_vm1, %v1181_v42  ;;  %v357_v42 = vld [vmem:[#allocation2 + $0x10] sm:$0xff] }
  0xd9   : > { %3675 = vmatprep.mubr.msk.f32.mxu1 %vm420_vm1, %v1182_v43  ;;  %3771 = vmatmul.mubr.msk.f32.gmra.mrb[50].mxu0 %vm420_vm1, %v2019_v44 }
  0xda   : > { %3773 = vmatprep.mubr.msk.f32.mxu0 %vm420_vm1, %v2020_v45 }
  0xdc   : > { %3676 = vmatmul.mubr.msk.f32.gmra.mrb[52].mxu1 %vm420_vm1, %v1183_v46 }
  0xdd   : > { %3678 = vmatprep.mubr.msk.f32.mxu1 %vm420_vm1, %v1184_v47  ;;  %3774 = vmatmul.mubr.msk.f32.gmra.mrb[52].mxu0 %vm420_vm1, %v2021_v48  ;;  %v360_v48 = vld [vmem:[#allocation2 + $0x28] sm:$0xff] }
  0xde   : > { %3776 = vmatprep.mubr.msk.f32.mxu0 %vm420_vm1, %v2022_v49 }
  0xe0   : > { %3679 = vmatmul.mubr.msk.f32.gmra.mrb[54].mxu1 %vm420_vm1, %v1185_v50  ;;  %v359_v50 = vld [vmem:[#allocation2 + $0x20] sm:$0xff] }
  0xe1   : > { %3681 = vmatprep.mubr.msk.f32.mxu1 %vm420_vm1, %v1186_v51  ;;  %3777 = vmatmul.mubr.msk.f32.gmra.mrb[54].mxu0 %vm420_vm1, %v2023_v52 }
  0xe2   : > { %3779 = vmatprep.mubr.msk.f32.mxu0 %vm420_vm1, %v2024_v53 }
  0xe4   : > { %3682 = vmatmul.mubr.msk.f32.gmra.mrb[56].mxu1 %vm420_vm1, %v1187_v54 }
  0xe5   : > { %3684 = vmatprep.mubr.msk.f32.mxu1 %vm420_vm1, %v1188_v55  ;;  %3780 = vmatmul.mubr.msk.f32.gmra.mrb[56].mxu0 %vm420_vm1, %v2025_v56  ;;  %v362_v56 = vld [vmem:[#allocation2 + $0x38] sm:$0xff] }
  0xe6   : > { %3782 = vmatprep.mubr.msk.f32.mxu0 %vm420_vm1, %v2026_v57 }
  0xe8   : > { %3685 = vmatmul.mubr.msk.f32.gmra.mrb[58].mxu1 %vm420_vm1, %v1189_v58  ;;  %v361_v58 = vld [vmem:[#allocation2 + $0x30] sm:$0xff] }
  0xe9   : > { %3687 = vmatprep.mubr.msk.f32.mxu1 %vm420_vm1, %v1190_v59  ;;  %3783 = vmatmul.mubr.msk.f32.gmra.mrb[58].mxu0 %vm420_vm1, %v2027_v60 }
  0xea   : > { %3785 = vmatprep.mubr.msk.f32.mxu0 %vm420_vm1, %v2028_v61 }
  0xec   : > { %3688 = vmatmul.mubr.msk.f32.gmra.mrb[60].mxu1 %vm420_vm1, %v1191_v62 }
  0xed   : > { %3690 = vmatprep.mubr.msk.f32.mxu1 %vm420_vm1, %v1192_v63  ;;  %3786 = vmatmul.mubr.msk.f32.gmra.mrb[60].mxu0 %vm420_vm1, %v2029_v0  ;;  %v364_v0 = vld [vmem:[#allocation2 + $0x48] sm:$0xff] }
  0xee   : > { %3788 = vmatprep.mubr.msk.f32.mxu0 %vm420_vm1, %v2030_v1 }
  0xf0   : > { %3691 = vmatmul.mubr.msk.f32.gmra.mrb[62].mxu1 %vm420_vm1, %v1193_v2  ;;  %v363_v2 = vld [vmem:[#allocation2 + $0x40] sm:$0xff] }
  0xf1   : > { %3789 = vmatmul.mubr.msk.f32.gmra.mrb[62].mxu0 %vm420_vm1, %v2031_v3 }
 0x107   : > { %v3501_v4 = vpop.f32.mrb[0].mxu1 }
 0x108   : > { %v683_v5 = vpop.f32.mrb[1].mxu1  ;;  %v1003_v38 = vadd.f32 %v3501_v4, %v356_v35  ;;  %v365_v35 = vld [vmem:[#allocation2 + $0x50] sm:$0xff] }
 0x109   : > { %v1002_v39 = vadd.f32 %v683_v5, %v355_v37 }
 0x10b   : > { %v3504_v6 = vpop.f32.mrb[2].mxu1 }
 0x10c   : > { %v693_v7 = vpop.f32.mrb[3].mxu1  ;;  %v1005_v46 = vadd.f32 %v3504_v6, %v358_v40  ;;  %v368_v40 = vld [vmem:[#allocation2 + $0x68] sm:$0xff] }
 0x10d   : > { %v1004_v47 = vadd.f32 %v693_v7, %v357_v42  ;;  %v367_v42 = vld [vmem:[#allocation2 + $0x60] sm:$0xff] }
 0x10f   : > { %v3507_v8 = vpop.f32.mrb[4].mxu1 }
 0x110   : > { %v703_v9 = vpop.f32.mrb[5].mxu1  ;;  %v1007_v54 = vadd.f32 %v3507_v8, %v360_v48  ;;  %v366_v8 = vld [vmem:[#allocation2 + $0x58] sm:$0xff]  ;;  %v369_v48 = vld [vmem:[#allocation2 + $0x70] sm:$0xff] }
 0x111   : > { %v1006_v55 = vadd.f32 %v703_v9, %v359_v50 }
 0x113   : > { %v3510_v10 = vpop.f32.mrb[6].mxu1 }
 0x114   : > { %v713_v11 = vpop.f32.mrb[7].mxu1  ;;  %v1009_v62 = vadd.f32 %v3510_v10, %v362_v56 }
 0x115   : > { %v1008_v63 = vadd.f32 %v713_v11, %v361_v58  ;;  %v374_v58 = vld [vmem:[#allocation2 + $0x98] sm:$0xff] }
 0x117   : > { %v4741_v12 = vpop.f32.mrb[8].mxu1 }
 0x118   : > { %v4743_v13 = vpop.f32.mrb[9].mxu1  ;;  %v1011_v6 = vadd.f32 %v4741_v12, %v364_v0  ;;  %v376_v0 = vld [vmem:[#allocation2 + $0xa8] sm:$0xff] }
 0x119   : > { %v1010_v7 = vadd.f32 %v4743_v13, %v363_v2  ;;  %v375_v2 = vld [vmem:[#allocation2 + $0xa0] sm:$0xff] }
 0x11b   : > { %v4745_v14 = vpop.f32.mrb[10].mxu1 }
 0x11c   : > { %v4747_v15 = vpop.f32.mrb[11].mxu1  ;;  %v1013_v11 = vadd.f32 %v4745_v14, %v366_v8  ;;  %v377_v8 = vld [vmem:[#allocation2 + $0xb0] sm:$0xff] }
 0x11f   : > { %v4749_v16 = vpop.f32.mrb[12].mxu1 }
 0x120   : > { %v4751_v17 = vpop.f32.mrb[13].mxu1  ;;  %v1015_v13 = vadd.f32 %v4749_v16, %v368_v40 }
 0x123   : > { %v4753_v18 = vpop.f32.mrb[14].mxu1 }
 0x124   : > { %v4755_v19 = vpop.f32.mrb[15].mxu1 }
 0x127   : > { %v4757_v20 = vpop.f32.mrb[16].mxu1 }
 0x128   : > { %v4759_v21 = vpop.f32.mrb[17].mxu1 }
 0x12b   : > { %v4761_v22 = vpop.f32.mrb[18].mxu1 }
 0x12c   : > { %v4763_v23 = vpop.f32.mrb[19].mxu1 }
 0x12f   : > { %v4765_v24 = vpop.f32.mrb[20].mxu1 }
 0x130   : > { %v4767_v25 = vpop.f32.mrb[21].mxu1 }
 0x133   : > { %v4769_v26 = vpop.f32.mrb[22].mxu1 }
 0x134   : > { %v4771_v27 = vpop.f32.mrb[23].mxu1 }
 0x137   : > { %v4773_v28 = vpop.f32.mrb[24].mxu1 }
 0x138   : > { %v4775_v29 = vpop.f32.mrb[25].mxu1 }
 0x13b   : > { %v4777_v30 = vpop.f32.mrb[26].mxu1 }
 0x13c   : > { %v4779_v31 = vpop.f32.mrb[27].mxu1 }
 0x13f   : > { %v4781_v32 = vpop.f32.mrb[28].mxu1 }
 0x140   : > { %v4783_v33 = vpop.f32.mrb[29].mxu1 }
 0x143   : > { %v4785_v34 = vpop.f32.mrb[30].mxu1 }
 0x144   : > { %v4787_v36 = vpop.f32.mrb[31].mxu1 }
 0x148   : > { %v3697_v41 = vpop.f32.mrb[0].mxu0 }
 0x149   : > { %v3796_v43 = vadd.f32 %v3697_v41, %v1003_v38  ;;  %v2359_v44 = vpop.f32.mrb[1].mxu0 }
 0x14a   : > { %v3800_v45 = vadd.f32 %v2359_v44, %v1002_v39  ;;  %v1012_v39 = vadd.f32 %v4747_v15, %v365_v35 }
 0x14b   : > { %2743 = vst [vmem:[#allocation2 + $0x8] sm:$0xff] %v3796_v43 }
 0x14c   : > { %2742 = vst [vmem:[#allocation2] sm:$0xff] %v3800_v45  ;;  %v3700_v49 = vpop.f32.mrb[2].mxu0  ;;  %v1014_v45 = vadd.f32 %v4751_v17, %v367_v42  ;;  %v382_v42 = vld [vmem:[#allocation2 + $0xd8] sm:$0xff] }
 0x14d   : > { %v3804_v51 = vadd.f32 %v3700_v49, %v1005_v46  ;;  %v2369_v52 = vpop.f32.mrb[3].mxu0  ;;  %v370_v46 = vld [vmem:[#allocation2 + $0x78] sm:$0xff] }
 0x14e   : > { %v3808_v53 = vadd.f32 %v2369_v52, %v1004_v47  ;;  %v1017_v15 = vadd.f32 %v4753_v18, %v370_v46  ;;  %v372_v52 = vld [vmem:[#allocation2 + $0x88] sm:$0xff] }
 0x14f   : > { %2745 = vst [vmem:[#allocation2 + $0x18] sm:$0xff] %v3804_v51  ;;  %v1016_v51 = vadd.f32 %v4755_v19, %v369_v48  ;;  %v1019_v17 = vadd.f32 %v4757_v20, %v372_v52  ;;  %v1021_v19 = vadd.f32 %v4761_v22, %v374_v58  ;;  %v384_v46 = vld [vmem:[#allocation2 + $0xe8] sm:$0xff]  ;;  %v383_v48 = vld [vmem:[#allocation2 + $0xe0] sm:$0xff]  ;;  %v385_v52 = vld [vmem:[#allocation2 + $0xf0] sm:$0xff] }
 0x150   : > { %2744 = vst [vmem:[#allocation2 + $0x10] sm:$0xff] %v3808_v53  ;;  %v3703_v57 = vpop.f32.mrb[4].mxu0  ;;  %v387_v58 = vld [vmem:[#allocation2 + $0x100] sm:$0xff] }
 0x151   : > { %v3812_v59 = vadd.f32 %v3703_v57, %v1007_v54  ;;  %v2379_v60 = vpop.f32.mrb[5].mxu0  ;;  %v371_v54 = vld [vmem:[#allocation2 + $0x80] sm:$0xff] }
 0x152   : > { %v3816_v61 = vadd.f32 %v2379_v60, %v1006_v55  ;;  %v1018_v57 = vadd.f32 %v4759_v21, %v371_v54  ;;  %v373_v60 = vld [vmem:[#allocation2 + $0x90] sm:$0xff]  ;;  %v1023_v21 = vadd.f32 %v4765_v24, %v376_v0 }
 0x153   : > { %2747 = vst [vmem:[#allocation2 + $0x28] sm:$0xff] %v3812_v59 }
 0x154   : > { %2746 = vst [vmem:[#allocation2 + $0x20] sm:$0xff] %v3816_v61  ;;  %v3706_v1 = vpop.f32.mrb[6].mxu0 }
 0x155   : > { %v3820_v3 = vadd.f32 %v3706_v1, %v1009_v62  ;;  %v2389_v4 = vpop.f32.mrb[7].mxu0 }
 0x156   : > { %v3824_v5 = vadd.f32 %v2389_v4, %v1008_v63  ;;  %v1020_v63 = vadd.f32 %v4763_v23, %v373_v60 }
 0x157   : > { %2749 = vst [vmem:[#allocation2 + $0x38] sm:$0xff] %v3820_v3 }
 0x158   : > { %2748 = vst [vmem:[#allocation2 + $0x30] sm:$0xff] %v3824_v5  ;;  %v3709_v9 = vpop.f32.mrb[8].mxu0  ;;  %v1022_v5 = vadd.f32 %v4767_v25, %v375_v2 }
 0x159   : > { %v3828_v37 = vadd.f32 %v3709_v9, %v1011_v6  ;;  %v2399_v10 = vpop.f32.mrb[9].mxu0  ;;  %v378_v6 = vld [vmem:[#allocation2 + $0xb8] sm:$0xff] }
 0x15a   : > { %v3832_v38 = vadd.f32 %v2399_v10, %v1010_v7  ;;  %v1025_v23 = vadd.f32 %v4769_v26, %v378_v6  ;;  %v380_v10 = vld [vmem:[#allocation2 + $0xc8] sm:$0xff] }
 0x15b   : > { %2751 = vst [vmem:[#allocation2 + $0x48] sm:$0xff] %v3828_v37  ;;  %v1024_v37 = vadd.f32 %v4771_v27, %v377_v8  ;;  %v1027_v25 = vadd.f32 %v4773_v28, %v380_v10  ;;  %v1029_v27 = vadd.f32 %v4777_v30, %v382_v42 }
 0x15c   : > { %2750 = vst [vmem:[#allocation2 + $0x40] sm:$0xff] %v3832_v38  ;;  %v3712_v41 = vpop.f32.mrb[10].mxu0 }
 0x15d   : > { %v3836_v12 = vadd.f32 %v3712_v41, %v1013_v11  ;;  %v2409_v43 = vpop.f32.mrb[11].mxu0  ;;  %v379_v11 = vld [vmem:[#allocation2 + $0xc0] sm:$0xff] }
 0x15e   : > { %v3840_v44 = vadd.f32 %v2409_v43, %v1012_v39  ;;  %v1026_v41 = vadd.f32 %v4775_v29, %v379_v11  ;;  %v381_v43 = vld [vmem:[#allocation2 + $0xd0] sm:$0xff]  ;;  %v1031_v29 = vadd.f32 %v4781_v32, %v384_v46  ;;  %v388_v32 = vld [vmem:[#allocation2 + $0x108] sm:$0xff] }
 0x15f   : > { %2753 = vst [vmem:[#allocation2 + $0x58] sm:$0xff] %v3836_v12 }
 0x160   : > { %2752 = vst [vmem:[#allocation2 + $0x50] sm:$0xff] %v3840_v44  ;;  %v3715_v47 = vpop.f32.mrb[12].mxu0 }
 0x161   : > { %v3844_v14 = vadd.f32 %v3715_v47, %v1015_v13  ;;  %v2419_v49 = vpop.f32.mrb[13].mxu0 }
 0x162   : > { %v3848_v50 = vadd.f32 %v2419_v49, %v1014_v45  ;;  %v1028_v45 = vadd.f32 %v4779_v31, %v381_v43 }
 0x163   : > { %2755 = vst [vmem:[#allocation2 + $0x68] sm:$0xff] %v3844_v14 }
 0x164   : > { %2754 = vst [vmem:[#allocation2 + $0x60] sm:$0xff] %v3848_v50  ;;  %v3718_v53 = vpop.f32.mrb[14].mxu0  ;;  %v1030_v50 = vadd.f32 %v4783_v33, %v383_v48 }
 0x165   : > { %v3852_v16 = vadd.f32 %v3718_v53, %v1017_v15  ;;  %v2429_v55 = vpop.f32.mrb[15].mxu0  ;;  %v386_v15 = vld [vmem:[#allocation2 + $0xf8] sm:$0xff] }
 0x166   : > { %v3856_v56 = vadd.f32 %v2429_v55, %v1016_v51  ;;  %v1033_v31 = vadd.f32 %v4785_v34, %v386_v15  ;;  %v389_v34 = vld [vmem:[#allocation2 + $0x110] sm:$0xff] }
 0x167   : > { %2757 = vst [vmem:[#allocation2 + $0x78] sm:$0xff] %v3852_v16  ;;  %v1032_v16 = vadd.f32 %v4787_v36, %v385_v52 }
 0x168   : > { %2756 = vst [vmem:[#allocation2 + $0x70] sm:$0xff] %v3856_v56  ;;  %v3721_v59 = vpop.f32.mrb[16].mxu0 }
 0x169   : > { %v3860_v18 = vadd.f32 %v3721_v59, %v1019_v17  ;;  %v2439_v61 = vpop.f32.mrb[17].mxu0 }
 0x16a   : > { %v3864_v62 = vadd.f32 %v2439_v61, %v1018_v57 }
 0x16b   : > { %2759 = vst [vmem:[#allocation2 + $0x88] sm:$0xff] %v3860_v18 }
 0x16c   : > { %2758 = vst [vmem:[#allocation2 + $0x80] sm:$0xff] %v3864_v62  ;;  %v3724_v1 = vpop.f32.mrb[18].mxu0  ;;  %v390_v62 = vld [vmem:[#allocation2 + $0x118] sm:$0xff] }
 0x16d   : > { %v3868_v20 = vadd.f32 %v3724_v1, %v1021_v19  ;;  %v2449_v3 = vpop.f32.mrb[19].mxu0 }
 0x16e   : > { %v3872_v4 = vadd.f32 %v2449_v3, %v1020_v63 }
 0x16f   : > { %2761 = vst [vmem:[#allocation2 + $0x98] sm:$0xff] %v3868_v20 }
 0x170   : > { %2760 = vst [vmem:[#allocation2 + $0x90] sm:$0xff] %v3872_v4  ;;  %v3727_v7 = vpop.f32.mrb[20].mxu0  ;;  %v392_v4 = vld [vmem:[#allocation2 + $0x128] sm:$0xff] }
 0x171   : > { %v3876_v22 = vadd.f32 %v3727_v7, %v1023_v21  ;;  %v2459_v9 = vpop.f32.mrb[21].mxu0 }
 0x172   : > { %v3880_v35 = vadd.f32 %v2459_v9, %v1022_v5  ;;  %v391_v5 = vld [vmem:[#allocation2 + $0x120] sm:$0xff] }
 0x173   : > { %2763 = vst [vmem:[#allocation2 + $0xa8] sm:$0xff] %v3876_v22 }
 0x174   : > { %2762 = vst [vmem:[#allocation2 + $0xa0] sm:$0xff] %v3880_v35  ;;  %v3730_v38 = vpop.f32.mrb[22].mxu0 }
 0x175   : > { %v3884_v24 = vadd.f32 %v3730_v38, %v1025_v23  ;;  %v2469_v39 = vpop.f32.mrb[23].mxu0  ;;  %v393_v38 = vld [vmem:[#allocation2 + $0x130] sm:$0xff] }
 0x176   : > { %v3888_v40 = vadd.f32 %v2469_v39, %v1024_v37  ;;  %v394_v37 = vld [vmem:[#allocation2 + $0x138] sm:$0xff] }
 0x177   : > { %2765 = vst [vmem:[#allocation2 + $0xb8] sm:$0xff] %v3884_v24 }
 0x178   : > { %2764 = vst [vmem:[#allocation2 + $0xb0] sm:$0xff] %v3888_v40  ;;  %v3733_v12 = vpop.f32.mrb[24].mxu0 }
 0x179   : > { %v3892_v26 = vadd.f32 %v3733_v12, %v1027_v25  ;;  %v2479_v44 = vpop.f32.mrb[25].mxu0  ;;  %v396_v12 = vld [vmem:[#allocation2 + $0x148] sm:$0xff] }
 0x17a   : > { %v3896_v13 = vadd.f32 %v2479_v44, %v1026_v41 }
 0x17b   : > { %2767 = vst [vmem:[#allocation2 + $0xc8] sm:$0xff] %v3892_v26  ;;  %v395_v26 = vld [vmem:[#allocation2 + $0x140] sm:$0xff] }
 0x17c   : > { %2766 = vst [vmem:[#allocation2 + $0xc0] sm:$0xff] %v3896_v13  ;;  %v3736_v47 = vpop.f32.mrb[26].mxu0 }
 0x17d   : > { %v3900_v28 = vadd.f32 %v3736_v47, %v1029_v27  ;;  %v2489_v14 = vpop.f32.mrb[27].mxu0 }
 0x17e   : > { %v3904_v49 = vadd.f32 %v2489_v14, %v1028_v45 }
 0x17f   : > { %2769 = vst [vmem:[#allocation2 + $0xd8] sm:$0xff] %v3900_v28  ;;  %v398_v28 = vld [vmem:[#allocation2 + $0x158] sm:$0xff] }
 0x180   : > { %2768 = vst [vmem:[#allocation2 + $0xd0] sm:$0xff] %v3904_v49  ;;  %v3739_v51 = vpop.f32.mrb[28].mxu0  ;;  %v397_v49 = vld [vmem:[#allocation2 + $0x150] sm:$0xff] }
 0x181   : > { %v3908_v30 = vadd.f32 %v3739_v51, %v1031_v29  ;;  %v2499_v53 = vpop.f32.mrb[29].mxu0 }
 0x182   : > { %v3912_v54 = vadd.f32 %v2499_v53, %v1030_v50 }
 0x183   : > { %2771 = vst [vmem:[#allocation2 + $0xe8] sm:$0xff] %v3908_v30 }
 0x184   : > { %2770 = vst [vmem:[#allocation2 + $0xe0] sm:$0xff] %v3912_v54  ;;  %v3742_v55 = vpop.f32.mrb[30].mxu0  ;;  %v400_v54 = vld [vmem:[#allocation2 + $0x168] sm:$0xff] }
 0x185   : > { %v3916_v56 = vadd.f32 %v3742_v55, %v1033_v31  ;;  %v2509_v17 = vpop.f32.mrb[31].mxu0 }
 0x186   : > { %v3920_v57 = vadd.f32 %v2509_v17, %v1032_v16  ;;  %v399_v16 = vld [vmem:[#allocation2 + $0x160] sm:$0xff] }
 0x187   : > { %2773 = vst [vmem:[#allocation2 + $0xf8] sm:$0xff] %v3916_v56  ;;  %v3647_v33 = vpop.f32.mrb[32].mxu1 }
 0x188   : > { %2772 = vst [vmem:[#allocation2 + $0xf0] sm:$0xff] %v3920_v57  ;;  %v3923_v59 = vadd.f32 %v3647_v33, %v388_v32  ;;  %v1681_v60 = vpop.f32.mrb[33].mxu1  ;;  %v3745_v18 = vpop.f32.mrb[32].mxu0 }
 0x189   : > { %v3929_v61 = vadd.f32 %v1681_v60, %v387_v58  ;;  %v2519_v19 = vpop.f32.mrb[33].mxu0 }
 0x18a   : > { %v3926_v63 = vadd.f32 %v3923_v59, %v3745_v18  ;;  %v402_v59 = vld [vmem:[#allocation2 + $0x178] sm:$0xff]  ;;  %v401_v18 = vld [vmem:[#allocation2 + $0x170] sm:$0xff] }
 0x18b   : > { %v3650_v0 = vpop.f32.mrb[34].mxu1  ;;  %v3932_v36 = vadd.f32 %v3929_v61, %v2519_v19 }
 0x18c   : > { %v3935_v1 = vadd.f32 %v3650_v0, %v390_v62  ;;  %v1691_v2 = vpop.f32.mrb[35].mxu1  ;;  %2775 = vst [vmem:[#allocation2 + $0x108] sm:$0xff] %v3926_v63  ;;  %v3748_v20 = vpop.f32.mrb[34].mxu0 }
 0x18d   : > { %v3941_v3 = vadd.f32 %v1691_v2, %v389_v34  ;;  %2774 = vst [vmem:[#allocation2 + $0x100] sm:$0xff] %v3932_v36  ;;  %v2529_v21 = vpop.f32.mrb[35].mxu0 }
 0x18e   : > { %v3938_v6 = vadd.f32 %v3935_v1, %v3748_v20  ;;  %v404_v1 = vld [vmem:[#allocation2 + $0x188] sm:$0xff]  ;;  %v403_v20 = vld [vmem:[#allocation2 + $0x180] sm:$0xff] }
 0x18f   : > { %v3653_v7 = vpop.f32.mrb[36].mxu1  ;;  %v3944_v8 = vadd.f32 %v3941_v3, %v2529_v21 }
 0x190   : > { %v3947_v22 = vadd.f32 %v3653_v7, %v392_v4  ;;  %v1701_v9 = vpop.f32.mrb[37].mxu1  ;;  %2777 = vst [vmem:[#allocation2 + $0x118] sm:$0xff] %v3938_v6  ;;  %v3751_v35 = vpop.f32.mrb[36].mxu0 }
 0x191   : > { %v3953_v23 = vadd.f32 %v1701_v9, %v391_v5  ;;  %2776 = vst [vmem:[#allocation2 + $0x110] sm:$0xff] %v3944_v8  ;;  %v2539_v10 = vpop.f32.mrb[37].mxu0 }
 0x192   : > { %v3950_v11 = vadd.f32 %v3947_v22, %v3751_v35  ;;  %v406_v22 = vld [vmem:[#allocation2 + $0x198] sm:$0xff]  ;;  %v405_v35 = vld [vmem:[#allocation2 + $0x190] sm:$0xff] }
 0x193   : > { %v3656_v24 = vpop.f32.mrb[38].mxu1  ;;  %v3956_v39 = vadd.f32 %v3953_v23, %v2539_v10 }
 0x194   : > { %v3959_v40 = vadd.f32 %v3656_v24, %v394_v37  ;;  %v1711_v25 = vpop.f32.mrb[39].mxu1  ;;  %2779 = vst [vmem:[#allocation2 + $0x128] sm:$0xff] %v3950_v11  ;;  %v3754_v41 = vpop.f32.mrb[38].mxu0 }
 0x195   : > { %v3965_v42 = vadd.f32 %v1711_v25, %v393_v38  ;;  %2778 = vst [vmem:[#allocation2 + $0x120] sm:$0xff] %v3956_v39  ;;  %v2549_v43 = vpop.f32.mrb[39].mxu0 }
 0x196   : > { %v3962_v44 = vadd.f32 %v3959_v40, %v3754_v41  ;;  %v408_v40 = vld [vmem:[#allocation2 + $0x1a8] sm:$0xff]  ;;  %v407_v41 = vld [vmem:[#allocation2 + $0x1a0] sm:$0xff] }
 0x197   : > { %v3659_v13 = vpop.f32.mrb[40].mxu1  ;;  %v3968_v27 = vadd.f32 %v3965_v42, %v2549_v43 }
 0x198   : > { %v3971_v45 = vadd.f32 %v3659_v13, %v396_v12  ;;  %v1721_v46 = vpop.f32.mrb[41].mxu1  ;;  %2781 = vst [vmem:[#allocation2 + $0x138] sm:$0xff] %v3962_v44  ;;  %v3757_v47 = vpop.f32.mrb[40].mxu0 }
 0x199   : > { %v3977_v48 = vadd.f32 %v1721_v46, %v395_v26  ;;  %2780 = vst [vmem:[#allocation2 + $0x130] sm:$0xff] %v3968_v27  ;;  %v2559_v14 = vpop.f32.mrb[41].mxu0 }
 0x19a   : > { %v3974_v29 = vadd.f32 %v3971_v45, %v3757_v47  ;;  %v410_v45 = vld [vmem:[#allocation2 + $0x1b8] sm:$0xff]  ;;  %v409_v47 = vld [vmem:[#allocation2 + $0x1b0] sm:$0xff] }
 0x19b   : > { %v3662_v50 = vpop.f32.mrb[42].mxu1  ;;  %v3980_v15 = vadd.f32 %v3977_v48, %v2559_v14 }
 0x19c   : > { %v3983_v51 = vadd.f32 %v3662_v50, %v398_v28  ;;  %v1731_v52 = vpop.f32.mrb[43].mxu1  ;;  %2783 = vst [vmem:[#allocation2 + $0x148] sm:$0xff] %v3974_v29  ;;  %v3760_v30 = vpop.f32.mrb[42].mxu0 }
 0x19d   : > { %v3989_v53 = vadd.f32 %v1731_v52, %v397_v49  ;;  %2782 = vst [vmem:[#allocation2 + $0x140] sm:$0xff] %v3980_v15  ;;  %v2569_v31 = vpop.f32.mrb[43].mxu0 }
 0x19e   : > { %v3986_v55 = vadd.f32 %v3983_v51, %v3760_v30  ;;  %v412_v51 = vld [vmem:[#allocation2 + $0x1c8] sm:$0xff]  ;;  %v411_v30 = vld [vmem:[#allocation2 + $0x1c0] sm:$0xff] }
 0x19f   : > { %v3665_v56 = vpop.f32.mrb[44].mxu1  ;;  %v3992_v17 = vadd.f32 %v3989_v53, %v2569_v31 }
 0x1a0   : > { %v3995_v32 = vadd.f32 %v3665_v56, %v400_v54  ;;  %v1741_v57 = vpop.f32.mrb[45].mxu1  ;;  %2785 = vst [vmem:[#allocation2 + $0x158] sm:$0xff] %v3986_v55  ;;  %v3763_v58 = vpop.f32.mrb[44].mxu0 }
 0x1a1   : > { %v4001_v33 = vadd.f32 %v1741_v57, %v399_v16  ;;  %2784 = vst [vmem:[#allocation2 + $0x150] sm:$0xff] %v3992_v17  ;;  %v2579_v60 = vpop.f32.mrb[45].mxu0 }
 0x1a2   : > { %v3998_v61 = vadd.f32 %v3995_v32, %v3763_v58  ;;  %v414_v32 = vld [vmem:[#allocation2 + $0x1d8] sm:$0xff]  ;;  %v413_v58 = vld [vmem:[#allocation2 + $0x1d0] sm:$0xff] }
 0x1a3   : > { %v3668_v62 = vpop.f32.mrb[46].mxu1  ;;  %v4004_v19 = vadd.f32 %v4001_v33, %v2579_v60 }
 0x1a4   : > { %v4007_v34 = vadd.f32 %v3668_v62, %v402_v59  ;;  %v1751_v63 = vpop.f32.mrb[47].mxu1  ;;  %2787 = vst [vmem:[#allocation2 + $0x168] sm:$0xff] %v3998_v61  ;;  %v3766_v0 = vpop.f32.mrb[46].mxu0 }
 0x1a5   : > { %v4013_v36 = vadd.f32 %v1751_v63, %v401_v18  ;;  %2786 = vst [vmem:[#allocation2 + $0x160] sm:$0xff] %v4004_v19  ;;  %v2589_v2 = vpop.f32.mrb[47].mxu0 }
 0x1a6   : > { %v4010_v3 = vadd.f32 %v4007_v34, %v3766_v0  ;;  %v416_v34 = vld [vmem:[#allocation2 + $0x1e8] sm:$0xff]  ;;  %v415_v0 = vld [vmem:[#allocation2 + $0x1e0] sm:$0xff] }
 0x1a7   : > { %v3671_v4 = vpop.f32.mrb[48].mxu1  ;;  %v4016_v21 = vadd.f32 %v4013_v36, %v2589_v2 }
 0x1a8   : > { %v4019_v5 = vadd.f32 %v3671_v4, %v404_v1  ;;  %v1761_v6 = vpop.f32.mrb[49].mxu1  ;;  %2789 = vst [vmem:[#allocation2 + $0x178] sm:$0xff] %v4010_v3  ;;  %v3769_v7 = vpop.f32.mrb[48].mxu0 }
 0x1a9   : > { %v4025_v8 = vadd.f32 %v1761_v6, %v403_v20  ;;  %2788 = vst [vmem:[#allocation2 + $0x170] sm:$0xff] %v4016_v21  ;;  %v2599_v9 = vpop.f32.mrb[49].mxu0 }
 0x1aa   : > { %v4022_v23 = vadd.f32 %v4019_v5, %v3769_v7  ;;  %v418_v5 = vld [vmem:[#allocation2 + $0x1f8] sm:$0xff]  ;;  %v417_v7 = vld [vmem:[#allocation2 + $0x1f0] sm:$0xff] }
 0x1ab   : > { %v3674_v37 = vpop.f32.mrb[50].mxu1  ;;  %v4028_v10 = vadd.f32 %v4025_v8, %v2599_v9 }
 0x1ac   : > { %v4031_v38 = vadd.f32 %v3674_v37, %v406_v22  ;;  %v1771_v11 = vpop.f32.mrb[51].mxu1  ;;  %2791 = vst [vmem:[#allocation2 + $0x188] sm:$0xff] %v4022_v23  ;;  %v3772_v24 = vpop.f32.mrb[50].mxu0 }
 0x1ad   : > { %v4037_v39 = vadd.f32 %v1771_v11, %v405_v35  ;;  %2790 = vst [vmem:[#allocation2 + $0x180] sm:$0xff] %v4028_v10  ;;  %v2609_v25 = vpop.f32.mrb[51].mxu0 }
 0x1ae   : > { %v4034_v42 = vadd.f32 %v4031_v38, %v3772_v24 }
 0x1af   : > { %v3677_v12 = vpop.f32.mrb[52].mxu1  ;;  %v4040_v43 = vadd.f32 %v4037_v39, %v2609_v25  ;;  %v2810_v39 = vld [vmem:[#allocation2] sm:$0xff] (!%p3296_p6)  ;;  %v2811_v25 = vld [vmem:[#allocation2 + $0x8] sm:$0xff] (!%p3296_p6) }
 0x1b0   : > { %v4043_v26 = vadd.f32 %v3677_v12, %v408_v40  ;;  %v1781_v44 = vpop.f32.mrb[53].mxu1  ;;  %2793 = vst [vmem:[#allocation2 + $0x198] sm:$0xff] %v4034_v42  ;;  %v3775_v13 = vpop.f32.mrb[52].mxu0  ;;  %v4817_v40 = vld [vmem:[%s5086_s2] ss:$0 sm:$0xff] (!%p3296_p6)  ;;  %v2812_v12 = vld [vmem:[#allocation2 + $0x10] sm:$0xff] (!%p3296_p6) }
 0x1b1   : > { %v4049_v27 = vadd.f32 %v1781_v44, %v407_v41  ;;  %2792 = vst [vmem:[#allocation2 + $0x190] sm:$0xff] %v4040_v43  ;;  %v2619_v46 = vpop.f32.mrb[53].mxu0  ;;  %v2881_v41 = vadd.f32 (!%p3296_p6), %v4817_v40, %v2810_v39  ;;  %v2882_v42 = vadd.f32 (!%p3296_p6), %v4817_v40, %v2811_v25  ;;  %v2813_v43 = vld [vmem:[#allocation2 + $0x18] sm:$0xff] (!%p3296_p6)  ;;  %v2883_v44 = vadd.f32 (!%p3296_p6), %v4817_v40, %v2812_v12  ;;  %v2842_v25 = vld [vmem:[#allocation2 + $0x100] sm:$0xff] (!%p3296_p6) }
 0x1b2   : > { %v4046_v48 = vadd.f32 %v4043_v26, %v3775_v13  ;;  %v2814_v26 = vld [vmem:[#allocation2 + $0x20] sm:$0xff] (!%p3296_p6)  ;;  %v2884_v13 = vadd.f32 (!%p3296_p6), %v4817_v40, %v2813_v43  ;;  %v2913_v12 = vadd.f32 (!%p3296_p6), %v4817_v40, %v2842_v25 }
 0x1b3   : > { %v3680_v28 = vpop.f32.mrb[54].mxu1  ;;  %v4052_v14 = vadd.f32 %v4049_v27, %v2619_v46  ;;  %v2885_v27 = vadd.f32 (!%p3296_p6), %v4817_v40, %v2814_v26  ;;  %v2816_v46 = vld [vmem:[#allocation2 + $0x30] sm:$0xff] (!%p3296_p6)  ;;  %2945 = vst [vmem:[%s5087_s3] sm:$0xff] (!%p3296_p6), %v2881_v41  ;;  %2946 = vst [vmem:[%s5087_s3 + $0x8] sm:$0xff] (!%p3296_p6), %v2882_v42  ;;  %v2843_v41 = vld [vmem:[#allocation2 + $0x108] sm:$0xff] (!%p3296_p6) }
 0x1b4   : > { %v4055_v49 = vadd.f32 %v3680_v28, %v410_v45  ;;  %v1791_v29 = vpop.f32.mrb[55].mxu1  ;;  %2795 = vst [vmem:[#allocation2 + $0x1a8] sm:$0xff] %v4046_v48  ;;  %v3778_v50 = vpop.f32.mrb[54].mxu0  ;;  %v2815_v45 = vld [vmem:[#allocation2 + $0x28] sm:$0xff] (!%p3296_p6)  ;;  %v2887_v28 = vadd.f32 (!%p3296_p6), %v4817_v40, %v2816_v46  ;;  %2947 = vst [vmem:[%s5087_s3 + $0x10] sm:$0xff] (!%p3296_p6), %v2883_v44  ;;  %v2844_v42 = vld [vmem:[#allocation2 + $0x110] sm:$0xff] (!%p3296_p6)  ;;  %v2914_v43 = vadd.f32 (!%p3296_p6), %v4817_v40, %v2843_v41 }
 0x1b5   : > { %v4061_v15 = vadd.f32 %v1791_v29, %v409_v47  ;;  %2794 = vst [vmem:[#allocation2 + $0x1a0] sm:$0xff] %v4052_v14  ;;  %v2629_v52 = vpop.f32.mrb[55].mxu0  ;;  %v2817_v47 = vld [vmem:[#allocation2 + $0x38] sm:$0xff] (!%p3296_p6)  ;;  %v2886_v48 = vadd.f32 (!%p3296_p6), %v4817_v40, %v2815_v45  ;;  %v2819_v29 = vld [vmem:[#allocation2 + $0x48] sm:$0xff] (!%p3296_p6)  ;;  %2948 = vst [vmem:[%s5087_s3 + $0x18] sm:$0xff] (!%p3296_p6), %v2884_v13  ;;  %v2915_v26 = vadd.f32 (!%p3296_p6), %v4817_v40, %v2844_v42 }
 0x1b6   : > { %v4058_v53 = vadd.f32 %v4055_v49, %v3778_v50  ;;  %v2888_v14 = vadd.f32 (!%p3296_p6), %v4817_v40, %v2817_v47  ;;  %v2818_v49 = vld [vmem:[#allocation2 + $0x40] sm:$0xff] (!%p3296_p6)  ;;  %v2820_v50 = vld [vmem:[#allocation2 + $0x50] sm:$0xff] (!%p3296_p6)  ;;  %2949 = vst [vmem:[%s5087_s3 + $0x20] sm:$0xff] (!%p3296_p6), %v2885_v27  ;;  %2951 = vst [vmem:[%s5087_s3 + $0x30] sm:$0xff] (!%p3296_p6), %v2887_v28 }
 0x1b7   : > { %v3683_v54 = vpop.f32.mrb[56].mxu1  ;;  %v4064_v31 = vadd.f32 %v4061_v15, %v2629_v52  ;;  %v2889_v15 = vadd.f32 (!%p3296_p6), %v4817_v40, %v2818_v49  ;;  %v2891_v52 = vadd.f32 (!%p3296_p6), %v4817_v40, %v2820_v50  ;;  %2950 = vst [vmem:[%s5087_s3 + $0x28] sm:$0xff] (!%p3296_p6), %v2886_v48  ;;  %v2845_v44 = vld [vmem:[#allocation2 + $0x118] sm:$0xff] (!%p3296_p6)  ;;  %v2846_v13 = vld [vmem:[#allocation2 + $0x120] sm:$0xff] (!%p3296_p6)  ;;  %v2847_v27 = vld [vmem:[#allocation2 + $0x128] sm:$0xff] (!%p3296_p6) }
 0x1b8   : > { %v4067_v16 = vadd.f32 %v3683_v54, %v412_v51  ;;  %v1801_v55 = vpop.f32.mrb[57].mxu1  ;;  %2797 = vst [vmem:[#allocation2 + $0x1b8] sm:$0xff] %v4058_v53  ;;  %v3781_v56 = vpop.f32.mrb[56].mxu0  ;;  %v2890_v51 = vadd.f32 (!%p3296_p6), %v4817_v40, %v2819_v29  ;;  %v2822_v53 = vld [vmem:[#allocation2 + $0x60] sm:$0xff] (!%p3296_p6)  ;;  %v2823_v54 = vld [vmem:[#allocation2 + $0x68] sm:$0xff] (!%p3296_p6)  ;;  %2952 = vst [vmem:[%s5087_s3 + $0x38] sm:$0xff] (!%p3296_p6), %v2888_v14  ;;  %v2916_v45 = vadd.f32 (!%p3296_p6), %v4817_v40, %v2845_v44 }
 0x1b9   : > { %v4073_v17 = vadd.f32 %v1801_v55, %v411_v30  ;;  %2796 = vst [vmem:[#allocation2 + $0x1b0] sm:$0xff] %v4064_v31  ;;  %v2639_v57 = vpop.f32.mrb[57].mxu0  ;;  %v2821_v30 = vld [vmem:[#allocation2 + $0x58] sm:$0xff] (!%p3296_p6)  ;;  %v2894_v55 = vadd.f32 (!%p3296_p6), %v4817_v40, %v2823_v54  ;;  %2953 = vst [vmem:[%s5087_s3 + $0x40] sm:$0xff] (!%p3296_p6), %v2889_v15  ;;  %v2917_v46 = vadd.f32 (!%p3296_p6), %v4817_v40, %v2846_v13  ;;  %v2848_v48 = vld [vmem:[#allocation2 + $0x130] sm:$0xff] (!%p3296_p6) }
 0x1ba   : > { %v4070_v33 = vadd.f32 %v4067_v16, %v3781_v56  ;;  %v2892_v31 = vadd.f32 (!%p3296_p6), %v4817_v40, %v2821_v30  ;;  %v2893_v16 = vadd.f32 (!%p3296_p6), %v4817_v40, %v2822_v53  ;;  %v2824_v56 = vld [vmem:[#allocation2 + $0x70] sm:$0xff] (!%p3296_p6)  ;;  %2954 = vst [vmem:[%s5087_s3 + $0x48] sm:$0xff] (!%p3296_p6), %v2890_v51  ;;  %2955 = vst [vmem:[%s5087_s3 + $0x50] sm:$0xff] (!%p3296_p6), %v2891_v52  ;;  %v2849_v28 = vld [vmem:[#allocation2 + $0x138] sm:$0xff] (!%p3296_p6) }
 0x1bb   : > { %v3686_v59 = vpop.f32.mrb[58].mxu1  ;;  %v4076_v60 = vadd.f32 %v4073_v17, %v2639_v57  ;;  %v2825_v17 = vld [vmem:[#allocation2 + $0x78] sm:$0xff] (!%p3296_p6)  ;;  %v2895_v57 = vadd.f32 (!%p3296_p6), %v4817_v40, %v2824_v56  ;;  %2958 = vst [vmem:[%s5087_s3 + $0x68] sm:$0xff] (!%p3296_p6), %v2894_v55  ;;  %v2918_v47 = vadd.f32 (!%p3296_p6), %v4817_v40, %v2847_v27  ;;  %v2850_v14 = vld [vmem:[#allocation2 + $0x140] sm:$0xff] (!%p3296_p6)  ;;  %2977 = vst [vmem:[%s5087_s3 + $0x100] sm:$0xff] (!%p3296_p6), %v2913_v12 }
 0x1bc   : > { %v4079_v18 = vadd.f32 %v3686_v59, %v414_v32  ;;  %v1811_v61 = vpop.f32.mrb[59].mxu1  ;;  %2799 = vst [vmem:[#allocation2 + $0x1c8] sm:$0xff] %v4070_v33  ;;  %v3784_v62 = vpop.f32.mrb[58].mxu0  ;;  %v2826_v32 = vld [vmem:[#allocation2 + $0x80] sm:$0xff] (!%p3296_p6)  ;;  %v2827_v59 = vld [vmem:[#allocation2 + $0x88] sm:$0xff] (!%p3296_p6)  ;;  %2956 = vst [vmem:[%s5087_s3 + $0x58] sm:$0xff] (!%p3296_p6), %v2892_v31  ;;  %v2919_v49 = vadd.f32 (!%p3296_p6), %v4817_v40, %v2848_v48  ;;  %v2920_v29 = vadd.f32 (!%p3296_p6), %v4817_v40, %v2849_v28 }
 0x1bd   : > { %v4085_v19 = vadd.f32 %v1811_v61, %v413_v58  ;;  %2798 = vst [vmem:[#allocation2 + $0x1c0] sm:$0xff] %v4076_v60  ;;  %v2649_v63 = vpop.f32.mrb[59].mxu0  ;;  %v2896_v58 = vadd.f32 (!%p3296_p6), %v4817_v40, %v2825_v17  ;;  %v2897_v33 = vadd.f32 (!%p3296_p6), %v4817_v40, %v2826_v32  ;;  %v2828_v60 = vld [vmem:[#allocation2 + $0x90] sm:$0xff] (!%p3296_p6)  ;;  %2957 = vst [vmem:[%s5087_s3 + $0x60] sm:$0xff] (!%p3296_p6), %v2893_v16  ;;  %v2851_v15 = vld [vmem:[#allocation2 + $0x148] sm:$0xff] (!%p3296_p6) }
 0x1be   : > { %v4082_v36 = vadd.f32 %v4079_v18, %v3784_v62  ;;  %v2829_v18 = vld [vmem:[#allocation2 + $0x98] sm:$0xff] (!%p3296_p6)  ;;  %v2898_v61 = vadd.f32 (!%p3296_p6), %v4817_v40, %v2827_v59  ;;  %v2899_v62 = vadd.f32 (!%p3296_p6), %v4817_v40, %v2828_v60  ;;  %2959 = vst [vmem:[%s5087_s3 + $0x70] sm:$0xff] (!%p3296_p6), %v2895_v57  ;;  %2978 = vst [vmem:[%s5087_s3 + $0x108] sm:$0xff] (!%p3296_p6), %v2914_v43  ;;  %v2852_v51 = vld [vmem:[#allocation2 + $0x150] sm:$0xff] (!%p3296_p6) }
 0x1bf   : > { %v3689_v1 = vpop.f32.mrb[60].mxu1  ;;  %v4088_v2 = vadd.f32 %v4085_v19, %v2649_v63  ;;  %v2900_v19 = vadd.f32 (!%p3296_p6), %v4817_v40, %v2829_v18  ;;  %v2831_v63 = vld [vmem:[#allocation2 + $0xa8] sm:$0xff] (!%p3296_p6)  ;;  %2960 = vst [vmem:[%s5087_s3 + $0x78] sm:$0xff] (!%p3296_p6), %v2896_v58  ;;  %2961 = vst [vmem:[%s5087_s3 + $0x80] sm:$0xff] (!%p3296_p6), %v2897_v33  ;;  %v2921_v50 = vadd.f32 (!%p3296_p6), %v4817_v40, %v2850_v14  ;;  %v2853_v52 = vld [vmem:[#allocation2 + $0x158] sm:$0xff] (!%p3296_p6) }
 0x1c0   : > { %v4091_v20 = vadd.f32 %v3689_v1, %v416_v34  ;;  %v1821_v3 = vpop.f32.mrb[61].mxu1  ;;  %2801 = vst [vmem:[#allocation2 + $0x1d8] sm:$0xff] %v4082_v36  ;;  %v3787_v4 = vpop.f32.mrb[60].mxu0  ;;  %v2830_v34 = vld [vmem:[#allocation2 + $0xa0] sm:$0xff] (!%p3296_p6)  ;;  %v2902_v1 = vadd.f32 (!%p3296_p6), %v4817_v40, %v2831_v63  ;;  %2962 = vst [vmem:[%s5087_s3 + $0x88] sm:$0xff] (!%p3296_p6), %v2898_v61  ;;  %v2922_v30 = vadd.f32 (!%p3296_p6), %v4817_v40, %v2851_v15  ;;  %v2855_v16 = vld [vmem:[#allocation2 + $0x168] sm:$0xff] (!%p3296_p6) }
 0x1c1   : > { %v4097_v21 = vadd.f32 %v1821_v3, %v415_v0  ;;  %2800 = vst [vmem:[#allocation2 + $0x1d0] sm:$0xff] %v4088_v2  ;;  %v2659_v6 = vpop.f32.mrb[61].mxu0  ;;  %v2832_v0 = vld [vmem:[#allocation2 + $0xb0] sm:$0xff] (!%p3296_p6)  ;;  %v2901_v36 = vadd.f32 (!%p3296_p6), %v4817_v40, %v2830_v34  ;;  %v2834_v3 = vld [vmem:[#allocation2 + $0xc0] sm:$0xff] (!%p3296_p6)  ;;  %2963 = vst [vmem:[%s5087_s3 + $0x90] sm:$0xff] (!%p3296_p6), %v2899_v62  ;;  %v2923_v53 = vadd.f32 (!%p3296_p6), %v4817_v40, %v2852_v51 }
 0x1c2   : > { %v4094_v8 = vadd.f32 %v4091_v20, %v3787_v4  ;;  %v2903_v2 = vadd.f32 (!%p3296_p6), %v4817_v40, %v2832_v0  ;;  %v2833_v20 = vld [vmem:[#allocation2 + $0xb8] sm:$0xff] (!%p3296_p6)  ;;  %v2835_v4 = vld [vmem:[#allocation2 + $0xc8] sm:$0xff] (!%p3296_p6)  ;;  %2964 = vst [vmem:[%s5087_s3 + $0x98] sm:$0xff] (!%p3296_p6), %v2900_v19  ;;  %2966 = vst [vmem:[%s5087_s3 + $0xa8] sm:$0xff] (!%p3296_p6), %v2902_v1  ;;  %v2924_v54 = vadd.f32 (!%p3296_p6), %v4817_v40, %v2853_v52 }
 0x1c3   : > { %v3692_v22 = vpop.f32.mrb[62].mxu1  ;;  %v4100_v9 = vadd.f32 %v4097_v21, %v2659_v6  ;;  %2809 = sbr.rel (%p3296_p6) target bundleno = 474 (0x1da), region = 40  ;;  %v2904_v21 = vadd.f32 (!%p3296_p6), %v4817_v40, %v2833_v20  ;;  %v2906_v6 = vadd.f32 (!%p3296_p6), %v4817_v40, %v2835_v4  ;;  %2965 = vst [vmem:[%s5087_s3 + $0xa0] sm:$0xff] (!%p3296_p6), %v2901_v36  ;;  %2979 = vst [vmem:[%s5087_s3 + $0x110] sm:$0xff] (!%p3296_p6), %v2915_v26  ;;  %v2854_v31 = vld [vmem:[#allocation2 + $0x160] sm:$0xff] (!%p3296_p6)  ;;  %v2856_v55 = vld [vmem:[#allocation2 + $0x170] sm:$0xff] (!%p3296_p6) }
 0x1c4   : > { %v4103_v35 = vadd.f32 %v3692_v22, %v418_v5  ;;  %v1831_v23 = vpop.f32.mrb[63].mxu1  ;;  %2803 = vst [vmem:[#allocation2 + $0x1e8] sm:$0xff] %v4094_v8  ;;  %v3790_v37 = vpop.f32.mrb[62].mxu0  ;;  %v2905_v5 = vadd.f32 (!%p3296_p6), %v4817_v40, %v2834_v3  ;;  %v2837_v8 = vld [vmem:[#allocation2 + $0xd8] sm:$0xff] (!%p3296_p6)  ;;  %v2838_v22 = vld [vmem:[#allocation2 + $0xe0] sm:$0xff] (!%p3296_p6)  ;;  %2967 = vst [vmem:[%s5087_s3 + $0xb0] sm:$0xff] (!%p3296_p6), %v2903_v2  ;;  %v2925_v56 = vadd.f32 (!%p3296_p6), %v4817_v40, %v2854_v31 }
 0x1c5   : > { %v4109_v10 = vadd.f32 %v1831_v23, %v417_v7  ;;  %2802 = vst [vmem:[#allocation2 + $0x1e0] sm:$0xff] %v4100_v9  ;;  %v2669_v38 = vpop.f32.mrb[63].mxu0  ;;  %v2836_v7 = vld [vmem:[#allocation2 + $0xd0] sm:$0xff] (!%p3296_p6)  ;;  %v2909_v23 = vadd.f32 (!%p3296_p6), %v4817_v40, %v2838_v22  ;;  %2968 = vst [vmem:[%s5087_s3 + $0xb8] sm:$0xff] (!%p3296_p6), %v2904_v21  ;;  %v2926_v17 = vadd.f32 (!%p3296_p6), %v4817_v40, %v2855_v16  ;;  %v2857_v57 = vld [vmem:[#allocation2 + $0x178] sm:$0xff] (!%p3296_p6) }
 0x1c6   : > { %v4106_v11 = vadd.f32 %v4103_v35, %v3790_v37  ;;  %v2907_v9 = vadd.f32 (!%p3296_p6), %v4817_v40, %v2836_v7  ;;  %v2908_v35 = vadd.f32 (!%p3296_p6), %v4817_v40, %v2837_v8  ;;  %v2839_v37 = vld [vmem:[#allocation2 + $0xe8] sm:$0xff] (!%p3296_p6)  ;;  %2969 = vst [vmem:[%s5087_s3 + $0xc0] sm:$0xff] (!%p3296_p6), %v2905_v5  ;;  %2970 = vst [vmem:[%s5087_s3 + $0xc8] sm:$0xff] (!%p3296_p6), %v2906_v6  ;;  %v2858_v58 = vld [vmem:[#allocation2 + $0x180] sm:$0xff] (!%p3296_p6) }
 0x1c7   : > { %v4112_v24 = vadd.f32 %v4109_v10, %v2669_v38  ;;  %v2840_v10 = vld [vmem:[#allocation2 + $0xf0] sm:$0xff] (!%p3296_p6)  ;;  %v2841_v38 = vld [vmem:[#allocation2 + $0xf8] sm:$0xff] (!%p3296_p6)  ;;  %2973 = vst [vmem:[%s5087_s3 + $0xe0] sm:$0xff] (!%p3296_p6), %v2909_v23  ;;  %2980 = vst [vmem:[%s5087_s3 + $0x118] sm:$0xff] (!%p3296_p6), %v2916_v45  ;;  %v2927_v32 = vadd.f32 (!%p3296_p6), %v4817_v40, %v2856_v55  ;;  %v2928_v59 = vadd.f32 (!%p3296_p6), %v4817_v40, %v2857_v57 }
 0x1c8   : > { %2805 = vst [vmem:[#allocation2 + $0x1f8] sm:$0xff] %v4106_v11  ;;  %v2910_v11 = vadd.f32 (!%p3296_p6), %v4817_v40, %v2839_v37  ;;  %v2912_v39 = vadd.f32 (!%p3296_p6), %v4817_v40, %v2841_v38  ;;  %2971 = vst [vmem:[%s5087_s3 + $0xd0] sm:$0xff] (!%p3296_p6), %v2907_v9  ;;  %v2859_v33 = vld [vmem:[#allocation2 + $0x188] sm:$0xff] (!%p3296_p6)  ;;  %v2929_v60 = vadd.f32 (!%p3296_p6), %v4817_v40, %v2858_v58  ;;  %v2860_v61 = vld [vmem:[#allocation2 + $0x190] sm:$0xff] (!%p3296_p6) }
 0x1c9   : > { %2804 = vst [vmem:[#allocation2 + $0x1f0] sm:$0xff] %v4112_v24  ;;  %v2911_v24 = vadd.f32 (!%p3296_p6), %v4817_v40, %v2840_v10  ;;  %2972 = vst [vmem:[%s5087_s3 + $0xd8] sm:$0xff] (!%p3296_p6), %v2908_v35  ;;  %v2930_v18 = vadd.f32 (!%p3296_p6), %v4817_v40, %v2859_v33  ;;  %v2861_v62 = vld [vmem:[#allocation2 + $0x198] sm:$0xff] (!%p3296_p6)  ;;  %v2862_v19 = vld [vmem:[#allocation2 + $0x1a0] sm:$0xff] (!%p3296_p6)  ;;  %v2931_v34 = vadd.f32 (!%p3296_p6), %v4817_v40, %v2860_v61 }
 0x1ca   : > { %2974 = vst [vmem:[%s5087_s3 + $0xe8] sm:$0xff] %v2910_v11  ;;  %2976 = vst [vmem:[%s5087_s3 + $0xf8] sm:$0xff] %v2912_v39  ;;  %v2932_v63 = vadd.f32 %v4817_v40, %v2861_v62  ;;  %v2933_v0 = vadd.f32 %v4817_v40, %v2862_v19  ;;  %v2863_v36 = vld [vmem:[#allocation2 + $0x1a8] sm:$0xff]  ;;  %v2864_v1 = vld [vmem:[#allocation2 + $0x1b0] sm:$0xff] }
 0x1cb   : > { %2975 = vst [vmem:[%s5087_s3 + $0xf0] sm:$0xff] %v2911_v24  ;;  %2981 = vst [vmem:[%s5087_s3 + $0x120] sm:$0xff] %v2917_v46  ;;  %v2865_v2 = vld [vmem:[#allocation2 + $0x1b8] sm:$0xff]  ;;  %v2934_v20 = vadd.f32 %v4817_v40, %v2863_v36  ;;  %v2935_v3 = vadd.f32 %v4817_v40, %v2864_v1  ;;  %v2866_v21 = vld [vmem:[#allocation2 + $0x1c0] sm:$0xff] }
 0x1cc   : > { %2982 = vst [vmem:[%s5087_s3 + $0x128] sm:$0xff] %v2918_v47  ;;  %2983 = vst [vmem:[%s5087_s3 + $0x130] sm:$0xff] %v2919_v49  ;;  %v2936_v4 = vadd.f32 %v4817_v40, %v2865_v2  ;;  %v2867_v5 = vld [vmem:[#allocation2 + $0x1c8] sm:$0xff]  ;;  %v2868_v6 = vld [vmem:[#allocation2 + $0x1d0] sm:$0xff]  ;;  %v2937_v7 = vadd.f32 %v4817_v40, %v2866_v21 }
 0x1cd   : > { %2984 = vst [vmem:[%s5087_s3 + $0x138] sm:$0xff] %v2920_v29  ;;  %2985 = vst [vmem:[%s5087_s3 + $0x140] sm:$0xff] %v2921_v50  ;;  %v2938_v8 = vadd.f32 %v4817_v40, %v2867_v5  ;;  %v2939_v22 = vadd.f32 %v4817_v40, %v2868_v6  ;;  %v2869_v9 = vld [vmem:[#allocation2 + $0x1d8] sm:$0xff]  ;;  %v2870_v35 = vld [vmem:[#allocation2 + $0x1e0] sm:$0xff] }
 0x1ce   : > { %2986 = vst [vmem:[%s5087_s3 + $0x148] sm:$0xff] %v2922_v30  ;;  %2987 = vst [vmem:[%s5087_s3 + $0x150] sm:$0xff] %v2923_v53  ;;  %v2871_v23 = vld [vmem:[#allocation2 + $0x1e8] sm:$0xff]  ;;  %v2940_v37 = vadd.f32 %v4817_v40, %v2869_v9  ;;  %v2941_v10 = vadd.f32 %v4817_v40, %v2870_v35 }
 0x1cf   : > { %2988 = vst [vmem:[%s5087_s3 + $0x158] sm:$0xff] %v2924_v54  ;;  %2989 = vst [vmem:[%s5087_s3 + $0x160] sm:$0xff] %v2925_v56  ;;  %v2942_v38 = vadd.f32 %v4817_v40, %v2871_v23  ;;  %v2873_v24 = vld [vmem:[#allocation2 + $0x1f8] sm:$0xff] }
 0x1d0   : > { %2990 = vst [vmem:[%s5087_s3 + $0x168] sm:$0xff] %v2926_v17  ;;  %2991 = vst [vmem:[%s5087_s3 + $0x170] sm:$0xff] %v2927_v32  ;;  %v2872_v11 = vld [vmem:[#allocation2 + $0x1f0] sm:$0xff]  ;;  %v2944_v25 = vadd.f32 %v4817_v40, %v2873_v24 }
 0x1d1   : > { %2992 = vst [vmem:[%s5087_s3 + $0x178] sm:$0xff] %v2928_v59  ;;  %2993 = vst [vmem:[%s5087_s3 + $0x180] sm:$0xff] %v2929_v60  ;;  %v2943_v39 = vadd.f32 %v4817_v40, %v2872_v11 }
 0x1d2   : > { %2994 = vst [vmem:[%s5087_s3 + $0x188] sm:$0xff] %v2930_v18  ;;  %2995 = vst [vmem:[%s5087_s3 + $0x190] sm:$0xff] %v2931_v34 }
 0x1d3   : > { %2996 = vst [vmem:[%s5087_s3 + $0x198] sm:$0xff] %v2932_v63  ;;  %2997 = vst [vmem:[%s5087_s3 + $0x1a0] sm:$0xff] %v2933_v0 }
 0x1d4   : > { %2998 = vst [vmem:[%s5087_s3 + $0x1a8] sm:$0xff] %v2934_v20  ;;  %2999 = vst [vmem:[%s5087_s3 + $0x1b0] sm:$0xff] %v2935_v3 }
 0x1d5   : > { %3000 = vst [vmem:[%s5087_s3 + $0x1b8] sm:$0xff] %v2936_v4  ;;  %3001 = vst [vmem:[%s5087_s3 + $0x1c0] sm:$0xff] %v2937_v7 }
 0x1d6   : > { %3002 = vst [vmem:[%s5087_s3 + $0x1c8] sm:$0xff] %v2938_v8  ;;  %3003 = vst [vmem:[%s5087_s3 + $0x1d0] sm:$0xff] %v2939_v22 }
 0x1d7   : > { %3004 = vst [vmem:[%s5087_s3 + $0x1d8] sm:$0xff] %v2940_v37  ;;  %3005 = vst [vmem:[%s5087_s3 + $0x1e0] sm:$0xff] %v2941_v10 }
 0x1d8   : > { %3006 = vst [vmem:[%s5087_s3 + $0x1e8] sm:$0xff] %v2942_v38  ;;  %3007 = vst [vmem:[%s5087_s3 + $0x1f0] sm:$0xff] %v2943_v39 }
 0x1d9   : > { %3008 = vst [vmem:[%s5087_s3 + $0x1f8] sm:$0xff] %v2944_v25 }
 0x1da PF: > { %s13_s14 = sadd.s32 1, %s4226_s14   ;;  %s5088_s12 = smov %s4222_s13 }
 0x1db   : > { %p10_p7 = scmp.ge.s32.totalorder %s13_s14, 5   ;;  %s5089_s13 = smov %s5091_s15 }
 0x1dd   :  { %12 = sbr.rel (!%p10_p7) target bundleno = 2 (0x2), region = 75 }

</bundles_post_ra>
